<compile_context>
chip_gen: v6e
topology: v6e:2x2x1
jax: 0.10.0
libtpu: 0.0.40
codegen_flags: <defaults>
</compile_context>

<pallas_src>
import functools

import jax
import jax.numpy as jnp
from jax.experimental import pallas as pl
from jax.experimental.pallas import tpu as pltpu


# ---------------------------------------------------------------------------
# Kernel 1: transposed conv (stride 2, k=3, pad=1, out_pad=1) + bias, plus
# per-image BatchNorm partial statistics.  One grid step == one batch image,
# flattened to (H*W, Cin); the 4 output parity quadrants live side by side on
# the lane axis -> y block is (H*W, 4*Cout).
# ---------------------------------------------------------------------------
def _deconv_stats_kernel(H, W, x_ref, w_ref, b_ref, y_ref, stats_ref, xpad_ref):
    hw = H * W
    cin = x_ref.shape[2]
    pad = xpad_ref.shape[0] - hw

    # Zero-padded copy of the image: rows [hw, hw+pad) are zeros, so reads that
    # run past the last image row pick up zeros (== 'same' zero padding).
    xf = x_ref[0].astype(jnp.float32)                            # (H*W, Cin)
    xpad_ref[pl.ds(0, hw), :] = xf
    xpad_ref[pl.ds(hw, pad), :] = jnp.zeros((pad, cin), jnp.float32)

    # Column-wrap validity mask, computed once and reused.
    idx = jax.lax.broadcasted_iota(jnp.int32, (hw, 1), 0)
    col_ok = (idx % W) < (W - 1)

    x00 = xf                                                     # x[m,   n  ]
    x01 = jnp.where(col_ok, xpad_ref[pl.ds(1, hw), :], 0.0)      # x[m,   n+1]
    x10 = xpad_ref[pl.ds(W, hw), :]                              # x[m+1, n  ] (zeros at m=H-1)
    x11 = jnp.where(col_ok, xpad_ref[pl.ds(W + 1, hw), :], 0.0)  # x[m+1, n+1]

    # 4 fused matmuls: each input shift feeds all 4 output quadrants at once.
    # bf16 inputs, f32 accumulation on the MXU.
    y = jnp.dot(x00.astype(jnp.bfloat16), w_ref[0], preferred_element_type=jnp.float32)
    y = y + jnp.dot(x01.astype(jnp.bfloat16), w_ref[1], preferred_element_type=jnp.float32)
    y = y + jnp.dot(x10.astype(jnp.bfloat16), w_ref[2], preferred_element_type=jnp.float32)
    y = y + jnp.dot(x11.astype(jnp.bfloat16), w_ref[3], preferred_element_type=jnp.float32)
    y = y + b_ref[...]                                           # (H*W, 4*Cout)

    y_ref[0] = y

    # BatchNorm partial stats for this image (finalized outside the kernel).
    s = jnp.sum(y, axis=0, keepdims=True)
    sq = jnp.sum(y * y, axis=0, keepdims=True)
    stats_ref[0] = jnp.concatenate([s, sq], axis=0)              # (2, 4*Cout)


# ---------------------------------------------------------------------------
# Kernel 2: BatchNorm affine apply + ReLU, row-tiled over a "parallel" grid.
# ---------------------------------------------------------------------------
def _bn_relu_kernel(y_ref, scale_ref, shift_ref, o_ref):
    o_ref[...] = jnp.maximum(y_ref[...] * scale_ref[...] + shift_ref[...], 0.0)


def _build_wstack(taps):
    """taps: (3, 3, Cin, Cout) ConvTranspose2d taps (torch weight transposed to
    (ky, kx, Cin, Cout)).  Returns (4, Cin, 4*Cout): entry p = (dm, dn) maps the
    input pixel shifted by (dm, dn) to all four output parity quadrants
    q = 2*a + b, with zero blocks where a tap does not contribute."""
    cin, cout = taps.shape[2], taps.shape[3]
    k_of = {(0, 0): 1, (1, 0): 2, (1, 1): 0}   # (output parity, input shift) -> tap index
    shifts = []
    for dm in (0, 1):
        for dn in (0, 1):
            cols = []
            for a in (0, 1):
                for b in (0, 1):
                    ky = k_of.get((a, dm))
                    kx = k_of.get((b, dn))
                    if ky is None or kx is None:
                        cols.append(jnp.zeros((cin, cout), jnp.float32))
                    else:
                        cols.append(taps[ky, kx])
            shifts.append(jnp.concatenate(cols, axis=1))          # (Cin, 4*Cout)
    return jnp.stack(shifts, axis=0)                              # (4, Cin, 4*Cout)


def _pick_row_tile(m):
    for t in (2048, 1024, 512, 256, 128, 64, 32, 16, 8):
        if m % t == 0:
            return t
    return m


def upsampler_block(x_nchw, params, eps=1e-3):
    """NCHW in / NCHW out, matching the PyTorch module (training-mode BN)."""
    n, cin, h, w = x_nchw.shape
    taps = params["w"]                                   # (3, 3, Cin, Cout)
    cout = taps.shape[-1]
    hw = h * w
    c4out = 4 * cout

    # NCHW -> (N, H*W, Cin); activations stored as bf16 for HBM/VMEM traffic.
    x = jnp.transpose(x_nchw, (0, 2, 3, 1)).reshape(n, hw, cin).astype(jnp.bfloat16)

    wstk = _build_wstack(taps).astype(jnp.bfloat16)      # (4, Cin, 4*Cout)
    bcat = jnp.tile(params["b"].reshape(1, cout), (1, 4))  # (1, 4*Cout) f32

    cparams = pltpu.CompilerParams(
        dimension_semantics=("parallel",),
        vmem_limit_bytes=64 * 1024 * 1024)

    kernel1 = functools.partial(_deconv_stats_kernel, h, w)
    y_pre, stats = pl.pallas_call(
        kernel1,
        grid=(n,),
        in_specs=[
            pl.BlockSpec((1, hw, cin), lambda b: (b, 0, 0)),
            pl.BlockSpec((4, cin, c4out), lambda b: (0, 0, 0)),
            pl.BlockSpec((1, c4out), lambda b: (0, 0)),
        ],
        out_specs=(
            pl.BlockSpec((1, hw, c4out), lambda b: (b, 0, 0)),
            pl.BlockSpec((1, 2, c4out), lambda b: (b, 0, 0)),
        ),
        out_shape=(
            jax.ShapeDtypeStruct((n, hw, c4out), jnp.float32),
            jax.ShapeDtypeStruct((n, 2, c4out), jnp.float32),
        ),
        scratch_shapes=[pltpu.VMEM((hw + w + 8, cin), jnp.float32)],
        compiler_params=cparams,
    )(x, wstk, bcat)

    # Finalize BatchNorm statistics (tiny, plain JAX): biased stats over N*2H*2W.
    count = float(n * 4 * hw)
    s = stats[:, 0, :].sum(axis=0).reshape(4, cout).sum(axis=0)
    sq = stats[:, 1, :].sum(axis=0).reshape(4, cout).sum(axis=0)
    mean = s / count
    var = jnp.maximum(sq / count - mean * mean, 0.0)
    scale = params["gamma"] * jax.lax.rsqrt(var + eps)
    shift = params["beta"] - mean * scale
    scale4 = jnp.tile(scale.reshape(1, cout), (1, 4))
    shift4 = jnp.tile(shift.reshape(1, cout), (1, 4))

    # Row-tiled BN apply + ReLU (still in quadrant layout, lane dim = 4*Cout).
    m_rows = n * hw
    tm = _pick_row_tile(m_rows)
    y2 = y_pre.reshape(m_rows, c4out)
    y_act = pl.pallas_call(
        _bn_relu_kernel,
        grid=(m_rows // tm,),
        in_specs=[
            pl.BlockSpec((tm, c4out), lambda i: (i, 0)),
            pl.BlockSpec((1, c4out), lambda i: (0, 0)),
            pl.BlockSpec((1, c4out), lambda i: (0, 0)),
        ],
        out_specs=pl.BlockSpec((tm, c4out), lambda i: (i, 0)),
        out_shape=jax.ShapeDtypeStruct((m_rows, c4out), jnp.float32),
        compiler_params=cparams,
    )(y2, scale4, shift4)

    # Interleave quadrants -> (N, 2H, 2W, Cout) -> NCHW.  Pure layout glue.
    out = y_act.reshape(n, h, w, 2, 2, cout)
    out = jnp.transpose(out, (0, 1, 3, 2, 4, 5)).reshape(n, 2 * h, 2 * w, cout)
    return jnp.transpose(out, (0, 3, 1, 2))


def init_params(key, cin, cout):
    """Deterministic synthetic parameters.  Conv weight stored as taps
    (ky, kx, Cin, Cout) == torch ConvTranspose2d weight.permute(2, 3, 0, 1)."""
    kw, kb = jax.random.split(key)
    return dict(
        w=0.25 * jax.random.normal(kw, (3, 3, cin, cout), jnp.float32),
        b=0.10 * jax.random.normal(kb, (cout,), jnp.float32),
        gamma=1.0 + 0.1 * jnp.arange(cout, dtype=jnp.float32),
        beta=0.05 * jnp.arange(cout, dtype=jnp.float32) - 0.1,
    )


def reference(x_nchw, p, eps=1e-3):
    """Pure-JAX ConvTranspose2d + BatchNorm(train) + ReLU at the kernel's input
    precision (x / conv weights rounded to bf16, f32 accumulation)."""
    x = jnp.transpose(x_nchw, (0, 2, 3, 1))
    x = x.astype(jnp.bfloat16).astype(jnp.float32)
    taps = p["w"].astype(jnp.bfloat16).astype(jnp.float32)
    # ConvTranspose2d(s=2, k=3, p=1, out_p=1) == direct conv on the 2x-dilated
    # input, padded (k-1-p, k-1-p+out_p) = (1, 2), with the spatially flipped kernel.
    rhs = jnp.flip(taps, axis=(0, 1))                      # HWIO, I=Cin, O=Cout
    y = jax.lax.conv_general_dilated(
        x, rhs, window_strides=(1, 1), padding=((1, 2), (1, 2)),
        lhs_dilation=(2, 2), dimension_numbers=("NHWC", "HWIO", "NHWC"),
        precision=jax.lax.Precision.HIGHEST)
    y = y + p["b"].reshape(1, 1, 1, -1)
    m = jnp.mean(y, axis=(0, 1, 2), keepdims=True)
    v = jnp.mean((y - m) ** 2, axis=(0, 1, 2), keepdims=True)
    y = (y - m) * jax.lax.rsqrt(v + eps) * p["gamma"].reshape(1, 1, 1, -1) \
        + p["beta"].reshape(1, 1, 1, -1)
    return jnp.transpose(jax.nn.relu(y), (0, 3, 1, 2))


if __name__ == "__main__":
    key = jax.random.PRNGKey(0)
    kx, kp = jax.random.split(key)

    N, CIN, COUT, H, W = 2, 4, 8, 16, 16       # NCHW input, like the PyTorch module
    x = jax.random.normal(kx, (N, CIN, H, W), jnp.float32)
    params = init_params(kp, CIN, COUT)

    fwd = jax.jit(upsampler_block)
    out = jax.block_until_ready(fwd(x, params))
    assert out.shape == (N, COUT, 2 * H, 2 * W), out.shape

    ref = jax.block_until_ready(reference(x, params))
    err = float(jnp.max(jnp.abs(out - ref)))
    if err > 5e-3:
        raise AssertionError(f"Pallas kernel mismatch vs reference: max |diff| = {err}")

    print("KERNEL_OK")
</pallas_src>

<mosaic_0001>
module attributes {stable_mosaic.version = 11 : i64} {
  func.func @_deconv_stats_kernel(%arg0: i32, %arg1: memref<1x256x4xbf16, #tpu.memory_space<vmem>>, %arg2: memref<4x4x32xbf16, #tpu.memory_space<vmem>>, %arg3: memref<1x32xf32, #tpu.memory_space<vmem>>, %arg4: memref<1x256x32xf32, #tpu.memory_space<vmem>>, %arg5: memref<1x2x32xf32, #tpu.memory_space<vmem>>, %arg6: memref<280x4xf32, #tpu.memory_space<vmem>>) attributes {dimension_semantics = [#tpu.dimension_semantics<parallel>], iteration_bounds = array<i64: 2>, scalar_prefetch = 0 : i64, scratch_operands = 1 : i64, tpu.core_type = #tpu.core_type<tc>, window_params = [{transform_indices = @transform_0, window_bounds = array<i64: 1, 256, 4>}, {pipeline_mode = #tpu.pipeline_mode<synchronous>, transform_indices = @transform_1, window_bounds = array<i64: 4, 4, 32>}, {pipeline_mode = #tpu.pipeline_mode<synchronous>, transform_indices = @transform_2, window_bounds = array<i64: 1, 32>}, {transform_indices = @transform_3, window_bounds = array<i64: 1, 256, 32>}, {transform_indices = @transform_4, window_bounds = array<i64: 1, 2, 32>}]} {
    %c0 = arith.constant 0 : index
    %c0_0 = arith.constant 0 : index
    %c0_1 = arith.constant 0 : index
    %0 = vector.load %arg1[%c0, %c0_0, %c0_1] : memref<1x256x4xbf16, #tpu.memory_space<vmem>>, vector<1x256x4xbf16>
    %1 = vector.shape_cast %0 : vector<1x256x4xbf16> to vector<256x4xbf16>
    %2 = arith.extf %1 : vector<256x4xbf16> to vector<256x4xf32>
    %c0_2 = arith.constant 0 : index
    %c0_3 = arith.constant 0 : index
    %3 = vector.load %arg6[%c0_2, %c0_3] : memref<280x4xf32, #tpu.memory_space<vmem>>, vector<256x4xf32>
    tpu.vector_store %arg6[%c0_2, %c0_3], %2 {strides = array<i32>} : memref<280x4xf32, #tpu.memory_space<vmem>>, vector<256x4xf32>,
    %cst = arith.constant 0.000000e+00 : f32
    %4 = vector.broadcast %cst : f32 to vector<24x4xf32>
    %c256 = arith.constant 256 : index
    %c0_4 = arith.constant 0 : index
    %5 = vector.load %arg6[%c256, %c0_4] : memref<280x4xf32, #tpu.memory_space<vmem>>, vector<24x4xf32>
    tpu.vector_store %arg6[%c256, %c0_4], %4 {strides = array<i32>} : memref<280x4xf32, #tpu.memory_space<vmem>>, vector<24x4xf32>,
    %6 = tpu.iota {dimensions = array<i32: 0>} : vector<256x1xi32>
    %c16_i32 = arith.constant 16 : i32
    %c0_i32 = arith.constant 0 : i32
    %7 = arith.cmpi eq, %c16_i32, %c0_i32 : i32
    %c1_i32 = arith.constant 1 : i32
    %8 = arith.select %7, %c1_i32, %c16_i32 : i32
    %9 = vector.broadcast %8 : i32 to vector<256x1xi32>
    %10 = arith.remsi %6, %9 : vector<256x1xi32>
    %c0_i32_5 = arith.constant 0 : i32
    %11 = vector.broadcast %c0_i32_5 : i32 to vector<256x1xi32>
    %12 = arith.cmpi ne, %10, %11 : vector<256x1xi32>
    %c0_i32_6 = arith.constant 0 : i32
    %13 = vector.broadcast %c0_i32_6 : i32 to vector<256x1xi32>
    %14 = arith.cmpi slt, %10, %13 : vector<256x1xi32>
    %c0_i32_7 = arith.constant 0 : i32
    %15 = arith.cmpi slt, %8, %c0_i32_7 : i32
    %16 = vector.broadcast %15 : i1 to vector<256x1xi1>
    %17 = vector.broadcast %16 : vector<256x1xi1> to vector<256x1xi1>
    %18 = arith.xori %14, %17 : vector<256x1xi1>
    %19 = arith.andi %18, %12 : vector<256x1xi1>
    %20 = vector.broadcast %8 : i32 to vector<256x1xi32>
    %21 = arith.addi %10, %20 : vector<256x1xi32>
    %22 = arith.select %19, %21, %10 : vector<256x1xi1>, vector<256x1xi32>
    %c15_i32 = arith.constant 15 : i32
    %23 = vector.broadcast %c15_i32 : i32 to vector<256x1xi32>
    %24 = arith.cmpi slt, %22, %23 : vector<256x1xi32>
    %c1 = arith.constant 1 : index
    %c0_8 = arith.constant 0 : index
    %25 = vector.load %arg6[%c1, %c0_8] : memref<280x4xf32, #tpu.memory_space<vmem>>, vector<256x4xf32>
    %cst_9 = arith.constant 0.000000e+00 : f32
    %26 = vector.shape_cast %24 : vector<256x1xi1> to vector<256x1xi1>
    %27 = vector.broadcast %26 : vector<256x1xi1> to vector<256x4xi1>
    %28 = vector.broadcast %cst_9 : f32 to vector<256x4xf32>
    %29 = arith.select %27, %25, %28 : vector<256x4xi1>, vector<256x4xf32>
    %c16 = arith.constant 16 : index
    %c0_10 = arith.constant 0 : index
    %30 = vector.load %arg6[%c16, %c0_10] : memref<280x4xf32, #tpu.memory_space<vmem>>, vector<256x4xf32>
    %c17 = arith.constant 17 : index
    %c0_11 = arith.constant 0 : index
    %31 = vector.load %arg6[%c17, %c0_11] : memref<280x4xf32, #tpu.memory_space<vmem>>, vector<256x4xf32>
    %cst_12 = arith.constant 0.000000e+00 : f32
    %32 = vector.shape_cast %24 : vector<256x1xi1> to vector<256x1xi1>
    %33 = vector.broadcast %32 : vector<256x1xi1> to vector<256x4xi1>
    %34 = vector.broadcast %cst_12 : f32 to vector<256x4xf32>
    %35 = arith.select %33, %31, %34 : vector<256x4xi1>, vector<256x4xf32>
    %36 = arith.truncf %2 : vector<256x4xf32> to vector<256x4xbf16>
    %c0_13 = arith.constant 0 : index
    %c0_14 = arith.constant 0 : index
    %c0_15 = arith.constant 0 : index
    %37 = vector.load %arg2[%c0_13, %c0_14, %c0_15] : memref<4x4x32xbf16, #tpu.memory_space<vmem>>, vector<1x4x32xbf16>
    %38 = vector.shape_cast %37 : vector<1x4x32xbf16> to vector<4x32xbf16>
    %cst_16 = arith.constant dense<0.000000e+00> : vector<256x32xf32>
    %39 = tpu.matmul %36, %38, %cst_16 {dimension_numbers = #tpu.dot_dimension_numbers<[1], [0], [0], [1], [0, 0, 1, 1], [], []>} : vector<256x4xbf16>, vector<4x32xbf16>, vector<256x32xf32> -> vector<256x32xf32>
    %40 = arith.truncf %29 : vector<256x4xf32> to vector<256x4xbf16>
    %c1_17 = arith.constant 1 : index
    %c0_18 = arith.constant 0 : index
    %c0_19 = arith.constant 0 : index
    %41 = vector.load %arg2[%c1_17, %c0_18, %c0_19] : memref<4x4x32xbf16, #tpu.memory_space<vmem>>, vector<1x4x32xbf16>
    %42 = vector.shape_cast %41 : vector<1x4x32xbf16> to vector<4x32xbf16>
    %cst_20 = arith.constant dense<0.000000e+00> : vector<256x32xf32>
    %43 = tpu.matmul %40, %42, %cst_20 {dimension_numbers = #tpu.dot_dimension_numbers<[1], [0], [0], [1], [0, 0, 1, 1], [], []>} : vector<256x4xbf16>, vector<4x32xbf16>, vector<256x32xf32> -> vector<256x32xf32>
    %44 = arith.addf %39, %43 : vector<256x32xf32>
    %45 = arith.truncf %30 : vector<256x4xf32> to vector<256x4xbf16>
    %c2 = arith.constant 2 : index
    %c0_21 = arith.constant 0 : index
    %c0_22 = arith.constant 0 : index
    %46 = vector.load %arg2[%c2, %c0_21, %c0_22] : memref<4x4x32xbf16, #tpu.memory_space<vmem>>, vector<1x4x32xbf16>
    %47 = vector.shape_cast %46 : vector<1x4x32xbf16> to vector<4x32xbf16>
    %cst_23 = arith.constant dense<0.000000e+00> : vector<256x32xf32>
    %48 = tpu.matmul %45, %47, %cst_23 {dimension_numbers = #tpu.dot_dimension_numbers<[1], [0], [0], [1], [0, 0, 1, 1], [], []>} : vector<256x4xbf16>, vector<4x32xbf16>, vector<256x32xf32> -> vector<256x32xf32>
    %49 = arith.addf %44, %48 : vector<256x32xf32>
    %50 = arith.truncf %35 : vector<256x4xf32> to vector<256x4xbf16>
    %c3 = arith.constant 3 : index
    %c0_24 = arith.constant 0 : index
    %c0_25 = arith.constant 0 : index
    %51 = vector.load %arg2[%c3, %c0_24, %c0_25] : memref<4x4x32xbf16, #tpu.memory_space<vmem>>, vector<1x4x32xbf16>
    %52 = vector.shape_cast %51 : vector<1x4x32xbf16> to vector<4x32xbf16>
    %cst_26 = arith.constant dense<0.000000e+00> : vector<256x32xf32>
    %53 = tpu.matmul %50, %52, %cst_26 {dimension_numbers = #tpu.dot_dimension_numbers<[1], [0], [0], [1], [0, 0, 1, 1], [], []>} : vector<256x4xbf16>, vector<4x32xbf16>, vector<256x32xf32> -> vector<256x32xf32>
    %54 = arith.addf %49, %53 : vector<256x32xf32>
    %c0_27 = arith.constant 0 : index
    %c0_28 = arith.constant 0 : index
    %55 = vector.load %arg3[%c0_27, %c0_28] : memref<1x32xf32, #tpu.memory_space<vmem>>, vector<1x32xf32>
    %56 = vector.broadcast %55 : vector<1x32xf32> to vector<256x32xf32>
    %57 = arith.addf %54, %56 : vector<256x32xf32>
    %c0_29 = arith.constant 0 : index
    %c0_30 = arith.constant 0 : index
    %c0_31 = arith.constant 0 : index
    %58 = vector.load %arg4[%c0_29, %c0_30, %c0_31] : memref<1x256x32xf32, #tpu.memory_space<vmem>>, vector<1x256x32xf32>
    %59 = vector.shape_cast %58 : vector<1x256x32xf32> to vector<256x32xf32>
    %60 = vector.shape_cast %57 : vector<256x32xf32> to vector<1x256x32xf32>
    tpu.vector_store %arg4[%c0_29, %c0_30, %c0_31], %60 {strides = array<i32>} : memref<1x256x32xf32, #tpu.memory_space<vmem>>, vector<1x256x32xf32>,
    %cst_32 = arith.constant dense<0.000000e+00> : vector<32xf32>
    %61 = vector.multi_reduction <add>, %57, %cst_32 [0] : vector<256x32xf32> to vector<32xf32>
    %62 = vector.shape_cast %61 : vector<32xf32> to vector<1x32xf32>
    %63 = arith.mulf %57, %57 : vector<256x32xf32>
    %cst_33 = arith.constant dense<0.000000e+00> : vector<32xf32>
    %64 = vector.multi_reduction <add>, %63, %cst_33 [0] : vector<256x32xf32> to vector<32xf32>
    %65 = vector.shape_cast %64 : vector<32xf32> to vector<1x32xf32>
    %66 = tpu.concatenate %62, %65 in 0 : vector<1x32xf32>, vector<1x32xf32> -> vector<2x32xf32>
    %c0_34 = arith.constant 0 : index
    %c0_35 = arith.constant 0 : index
    %c0_36 = arith.constant 0 : index
    %67 = vector.load %arg5[%c0_34, %c0_35, %c0_36] : memref<1x2x32xf32, #tpu.memory_space<vmem>>, vector<1x2x32xf32>
    %68 = vector.shape_cast %67 : vector<1x2x32xf32> to vector<2x32xf32>
    %69 = vector.shape_cast %66 : vector<2x32xf32> to vector<1x2x32xf32>
    tpu.vector_store %arg5[%c0_34, %c0_35, %c0_36], %69 {strides = array<i32>} : memref<1x2x32xf32, #tpu.memory_space<vmem>>, vector<1x2x32xf32>,
    return
  }
  func.func @transform_0(%arg0: i32) -> (i32, i32, i32) {
    %c0_i32 = arith.constant 0 : i32
    %c0_i32_0 = arith.constant 0 : i32
    %c0_i32_1 = arith.constant 0 : i32
    return %arg0, %c0_i32, %c0_i32_0 : i32, i32, i32
  }
  func.func @transform_1(%arg0: i32) -> (i32, i32, i32) {
    %c0_i32 = arith.constant 0 : i32
    %c0_i32_0 = arith.constant 0 : i32
    %c0_i32_1 = arith.constant 0 : i32
    %c0_i32_2 = arith.constant 0 : i32
    return %c0_i32, %c0_i32_0, %c0_i32_1 : i32, i32, i32
  }
  func.func @transform_2(%arg0: i32) -> (i32, i32) {
    %c0_i32 = arith.constant 0 : i32
    %c0_i32_0 = arith.constant 0 : i32
    %c0_i32_1 = arith.constant 0 : i32
    return %c0_i32, %c0_i32_0 : i32, i32
  }
  func.func @transform_3(%arg0: i32) -> (i32, i32, i32) {
    %c0_i32 = arith.constant 0 : i32
    %c0_i32_0 = arith.constant 0 : i32
    %c0_i32_1 = arith.constant 0 : i32
    return %arg0, %c0_i32, %c0_i32_0 : i32, i32, i32
  }
  func.func @transform_4(%arg0: i32) -> (i32, i32, i32) {
    %c0_i32 = arith.constant 0 : i32
    %c0_i32_0 = arith.constant 0 : i32
    %c0_i32_1 = arith.constant 0 : i32
    return %arg0, %c0_i32, %c0_i32_0 : i32, i32, i32
  }
}

module attributes {stable_mosaic.version = 11 : i64} {
  func.func @_bn_relu_kernel(%arg0: i32, %arg1: memref<512x32xf32, #tpu.memory_space<vmem>>, %arg2: memref<1x32xf32, #tpu.memory_space<vmem>>, %arg3: memref<1x32xf32, #tpu.memory_space<vmem>>, %arg4: memref<512x32xf32, #tpu.memory_space<vmem>>) attributes {dimension_semantics = [#tpu.dimension_semantics<parallel>], iteration_bounds = array<i64: 1>, scalar_prefetch = 0 : i64, scratch_operands = 0 : i64, tpu.core_type = #tpu.core_type<tc>, window_params = [{transform_indices = @transform_0, window_bounds = array<i64: 512, 32>}, {pipeline_mode = #tpu.pipeline_mode<synchronous>, transform_indices = @transform_1, window_bounds = array<i64: 1, 32>}, {pipeline_mode = #tpu.pipeline_mode<synchronous>, transform_indices = @transform_2, window_bounds = array<i64: 1, 32>}, {transform_indices = @transform_3, window_bounds = array<i64: 512, 32>}]} {
    %c0 = arith.constant 0 : index
    %c0_0 = arith.constant 0 : index
    %0 = vector.load %arg1[%c0, %c0_0] : memref<512x32xf32, #tpu.memory_space<vmem>>, vector<512x32xf32>
    %c0_1 = arith.constant 0 : index
    %c0_2 = arith.constant 0 : index
    %1 = vector.load %arg2[%c0_1, %c0_2] : memref<1x32xf32, #tpu.memory_space<vmem>>, vector<1x32xf32>
    %2 = vector.broadcast %1 : vector<1x32xf32> to vector<512x32xf32>
    %3 = arith.mulf %0, %2 : vector<512x32xf32>
    %c0_3 = arith.constant 0 : index
    %c0_4 = arith.constant 0 : index
    %4 = vector.load %arg3[%c0_3, %c0_4] : memref<1x32xf32, #tpu.memory_space<vmem>>, vector<1x32xf32>
    %5 = vector.broadcast %4 : vector<1x32xf32> to vector<512x32xf32>
    %6 = arith.addf %3, %5 : vector<512x32xf32>
    %cst = arith.constant 0.000000e+00 : f32
    %7 = vector.broadcast %cst : f32 to vector<512x32xf32>
    %8 = arith.maximumf %6, %7 : vector<512x32xf32>
    %c0_5 = arith.constant 0 : index
    %c0_6 = arith.constant 0 : index
    %9 = vector.load %arg4[%c0_5, %c0_6] : memref<512x32xf32, #tpu.memory_space<vmem>>, vector<512x32xf32>
    tpu.vector_store %arg4[%c0_5, %c0_6], %8 {strides = array<i32>} : memref<512x32xf32, #tpu.memory_space<vmem>>, vector<512x32xf32>,
    return
  }
  func.func @transform_0(%arg0: i32) -> (i32, i32) {
    %c0_i32 = arith.constant 0 : i32
    %c0_i32_0 = arith.constant 0 : i32
    return %arg0, %c0_i32 : i32, i32
  }
  func.func @transform_1(%arg0: i32) -> (i32, i32) {
    %c0_i32 = arith.constant 0 : i32
    %c0_i32_0 = arith.constant 0 : i32
    %c0_i32_1 = arith.constant 0 : i32
    return %c0_i32, %c0_i32_0 : i32, i32
  }
  func.func @transform_2(%arg0: i32) -> (i32, i32) {
    %c0_i32 = arith.constant 0 : i32
    %c0_i32_0 = arith.constant 0 : i32
    %c0_i32_1 = arith.constant 0 : i32
    return %c0_i32, %c0_i32_0 : i32, i32
  }
  func.func @transform_3(%arg0: i32) -> (i32, i32) {
    %c0_i32 = arith.constant 0 : i32
    %c0_i32_0 = arith.constant 0 : i32
    return %arg0, %c0_i32 : i32, i32
  }
}

</mosaic_0001>

<bundles_post_ra>
// kernel: upsampler_block.3
= control target key start
LH: loop header
LB: loop body
LE: loop exit
PB: predicated region body
PF: predicated region fallthrough
CT: control target
= control target key end

     0   :  { %vm284_vm0 = vcmask 261120   ;;  %s961_s0 = inlined_call_operand.vmem [shape: f32[512,32], index: 0, kind: input, shape index: {}]   ;;  %s962_s1 = inlined_call_operand.vmem [shape: f32[1,32], index: 1, kind: input, shape index: {}]   ;;  %s963_s2 = inlined_call_operand.vmem [shape: f32[1,32], index: 2, kind: input, shape index: {}]   ;;  %s964_s3 = inlined_call_operand.vmem [shape: f32[512,32], index: 3, kind: output, shape index: {}]  }
   0x1   :  { %v14_v0 = vld [vmem:[%s961_s0] sm:$0xff]  ;;  %v15_v4 = vld [vmem:[%s961_s0 + $0x8] sm:$0xff]  ;;  %v16_v5 = vld [vmem:[%s961_s0 + $0x10] sm:$0xff] }
   0x2   :  { %v381_v1 = vld [vmem:[%s962_s1] ss:$0 sm:$0xff]  ;;  %v17_v6 = vld [vmem:[%s961_s0 + $0x18] sm:$0xff]  ;;  %v19_v11 = vld [vmem:[%s961_s0 + $0x28] sm:$0xff] }
   0x3   :  { %v386_v2 = vld [vmem:[%s963_s2] ss:$0 sm:$0xff]  ;;  %v85_v3 = vmul.f32 %v381_v1, %v14_v0  ;;  %v86_v7 = vmul.f32 %v381_v1, %v15_v4  ;;  %v87_v8 = vmul.f32 %v381_v1, %v16_v5  ;;  %v88_v9 = vmul.f32 %v381_v1, %v17_v6  ;;  %v20_v12 = vld [vmem:[%s961_s0 + $0x30] sm:$0xff]  ;;  %v21_v17 = vld [vmem:[%s961_s0 + $0x38] sm:$0xff] }
   0x4   :  { %v18_v10 = vld [vmem:[%s961_s0 + $0x20] sm:$0xff]  ;;  %v90_v15 = vmul.f32 %v381_v1, %v19_v11  ;;  %v91_v16 = vmul.f32 %v381_v1, %v20_v12  ;;  %v92_v21 = vmul.f32 %v381_v1, %v21_v17  ;;  %v23_v27 = vld [vmem:[%s961_s0 + $0x48] sm:$0xff]  ;;  %v24_v28 = vld [vmem:[%s961_s0 + $0x50] sm:$0xff] }
   0x5   :  { %v156_v13 = vadd.f32 %v386_v2, %v85_v3  ;;  %v89_v14 = vmul.f32 %v381_v1, %v18_v10  ;;  %v157_v18 = vadd.f32 %v386_v2, %v86_v7  ;;  %v158_v19 = vadd.f32 %v386_v2, %v87_v8  ;;  %v22_v22 = vld [vmem:[%s961_s0 + $0x40] sm:$0xff]  ;;  %v25_v29 = vld [vmem:[%s961_s0 + $0x58] sm:$0xff]  ;;  %v27_v35 = vld [vmem:[%s961_s0 + $0x68] sm:$0xff] }
   0x6   :  { %v159_v20 = vadd.f32 %v386_v2, %v88_v9  ;;  %v161_v25 = vadd.f32 %v386_v2, %v90_v15  ;;  %v162_v26 = vadd.f32 %v386_v2, %v91_v16  ;;  %v163_v33 = vadd.f32 %v386_v2, %v92_v21  ;;  %v26_v34 = vld [vmem:[%s961_s0 + $0x60] sm:$0xff]  ;;  %v28_v36 = vld [vmem:[%s961_s0 + $0x70] sm:$0xff]  ;;  %v29_v41 = vld [vmem:[%s961_s0 + $0x78] sm:$0xff] }
   0x7   :  { %v220_v23 = vmax.f32 %v156_v13, 0.0  ;;  %v160_v24 = vadd.f32 %v386_v2, %v89_v14  ;;  %v221_v30 = vmax.f32 %v157_v18, 0.0  ;;  %v222_v31 = vmax.f32 %v158_v19, 0.0  ;;  %v30_v54 = vld [vmem:[%s961_s0 + $0x80] sm:$0xff]  ;;  %v31_v59 = vld [vmem:[%s961_s0 + $0x88] sm:$0xff]  ;;  %v32_v60 = vld [vmem:[%s961_s0 + $0x90] sm:$0xff] }
   0x8   :  { %v223_v32 = vmax.f32 %v159_v20, 0.0  ;;  %v225_v38 = vmax.f32 %v161_v25, 0.0  ;;  %v226_v39 = vmax.f32 %v162_v26, 0.0  ;;  %v93_v40 = vmul.f32 %v381_v1, %v22_v22  ;;  %v33_v61 = vld [vmem:[%s961_s0 + $0x98] sm:$0xff]  ;;  %v34_v4 = vld [vmem:[%s961_s0 + $0xa0] sm:$0xff]  ;;  %v35_v5 = vld [vmem:[%s961_s0 + $0xa8] sm:$0xff] }
   0x9   :  { %285 = vst.msk [vmem:[%s964_s3] sm:$0xff] %vm284_vm0, %v220_v23  ;;  %v224_v37 = vmax.f32 %v160_v24, 0.0  ;;  %286 = vst.msk [vmem:[%s964_s3 + $0x8] sm:$0xff] %vm284_vm0, %v221_v30  ;;  %v227_v42 = vmax.f32 %v163_v33, 0.0  ;;  %v94_v43 = vmul.f32 %v381_v1, %v23_v27  ;;  %v95_v44 = vmul.f32 %v381_v1, %v24_v28  ;;  %v36_v6 = vld [vmem:[%s961_s0 + $0xb0] sm:$0xff]  ;;  %v37_v11 = vld [vmem:[%s961_s0 + $0xb8] sm:$0xff] }
   0xa   :  { %287 = vst.msk [vmem:[%s964_s3 + $0x10] sm:$0xff] %vm284_vm0, %v222_v31  ;;  %288 = vst.msk [vmem:[%s964_s3 + $0x18] sm:$0xff] %vm284_vm0, %v223_v32  ;;  %v96_v45 = vmul.f32 %v381_v1, %v25_v29  ;;  %v164_v46 = vadd.f32 %v386_v2, %v93_v40  ;;  %v97_v47 = vmul.f32 %v381_v1, %v26_v34  ;;  %v38_v24 = vld [vmem:[%s961_s0 + $0xc0] sm:$0xff]  ;;  %v39_v29 = vld [vmem:[%s961_s0 + $0xc8] sm:$0xff] }
   0xb   :  { %289 = vst.msk [vmem:[%s964_s3 + $0x20] sm:$0xff] %vm284_vm0, %v224_v37  ;;  %290 = vst.msk [vmem:[%s964_s3 + $0x28] sm:$0xff] %vm284_vm0, %v225_v38  ;;  %v98_v48 = vmul.f32 %v381_v1, %v27_v35  ;;  %v99_v49 = vmul.f32 %v381_v1, %v28_v36  ;;  %v165_v50 = vadd.f32 %v386_v2, %v94_v43  ;;  %v40_v30 = vld [vmem:[%s961_s0 + $0xd0] sm:$0xff]  ;;  %v41_v31 = vld [vmem:[%s961_s0 + $0xd8] sm:$0xff] }
   0xc   :  { %291 = vst.msk [vmem:[%s964_s3 + $0x30] sm:$0xff] %vm284_vm0, %v226_v39  ;;  %292 = vst.msk [vmem:[%s964_s3 + $0x38] sm:$0xff] %vm284_vm0, %v227_v42  ;;  %v166_v51 = vadd.f32 %v386_v2, %v95_v44  ;;  %v167_v52 = vadd.f32 %v386_v2, %v96_v45  ;;  %v100_v53 = vmul.f32 %v381_v1, %v29_v41  ;;  %v228_v55 = vmax.f32 %v164_v46, 0.0  ;;  %v42_v36 = vld [vmem:[%s961_s0 + $0xe0] sm:$0xff]  ;;  %v43_v37 = vld [vmem:[%s961_s0 + $0xe8] sm:$0xff] }
   0xd   :  { %v168_v56 = vadd.f32 %v386_v2, %v97_v47  ;;  %v169_v57 = vadd.f32 %v386_v2, %v98_v48  ;;  %v170_v58 = vadd.f32 %v386_v2, %v99_v49  ;;  %v229_v62 = vmax.f32 %v165_v50, 0.0  ;;  %v44_v38 = vld [vmem:[%s961_s0 + $0xf0] sm:$0xff]  ;;  %v45_v43 = vld [vmem:[%s961_s0 + $0xf8] sm:$0xff] }
   0xe   :  { %v230_v63 = vmax.f32 %v166_v51, 0.0  ;;  %v231_v0 = vmax.f32 %v167_v52, 0.0  ;;  %v171_v3 = vadd.f32 %v386_v2, %v100_v53  ;;  %293 = vst.msk [vmem:[%s964_s3 + $0x40] sm:$0xff] %vm284_vm0, %v228_v55  ;;  %v101_v10 = vmul.f32 %v381_v1, %v30_v54 }
   0xf   :  { %v232_v7 = vmax.f32 %v168_v56, 0.0  ;;  %v233_v8 = vmax.f32 %v169_v57, 0.0  ;;  %v234_v9 = vmax.f32 %v170_v58, 0.0  ;;  %294 = vst.msk [vmem:[%s964_s3 + $0x48] sm:$0xff] %vm284_vm0, %v229_v62  ;;  %v102_v13 = vmul.f32 %v381_v1, %v31_v59  ;;  %v46_v56 = vld [vmem:[%s961_s0 + $0x100] sm:$0xff]  ;;  %v48_v62 = vld [vmem:[%s961_s0 + $0x110] sm:$0xff] }
  0x10   :  { %295 = vst.msk [vmem:[%s964_s3 + $0x50] sm:$0xff] %vm284_vm0, %v230_v63  ;;  %296 = vst.msk [vmem:[%s964_s3 + $0x58] sm:$0xff] %vm284_vm0, %v231_v0  ;;  %v235_v12 = vmax.f32 %v171_v3, 0.0  ;;  %v103_v14 = vmul.f32 %v381_v1, %v32_v60  ;;  %v104_v15 = vmul.f32 %v381_v1, %v33_v61  ;;  %v172_v16 = vadd.f32 %v386_v2, %v101_v10  ;;  %v47_v61 = vld [vmem:[%s961_s0 + $0x108] sm:$0xff]  ;;  %v49_v63 = vld [vmem:[%s961_s0 + $0x118] sm:$0xff] }
  0x11   :  { %297 = vst.msk [vmem:[%s964_s3 + $0x60] sm:$0xff] %vm284_vm0, %v232_v7  ;;  %298 = vst.msk [vmem:[%s964_s3 + $0x68] sm:$0xff] %vm284_vm0, %v233_v8  ;;  %v105_v17 = vmul.f32 %v381_v1, %v34_v4  ;;  %v106_v18 = vmul.f32 %v381_v1, %v35_v5  ;;  %v107_v19 = vmul.f32 %v381_v1, %v36_v6  ;;  %v50_v6 = vld [vmem:[%s961_s0 + $0x120] sm:$0xff]  ;;  %v51_v7 = vld [vmem:[%s961_s0 + $0x128] sm:$0xff] }
  0x12   :  { %299 = vst.msk [vmem:[%s964_s3 + $0x70] sm:$0xff] %vm284_vm0, %v234_v9  ;;  %300 = vst.msk [vmem:[%s964_s3 + $0x78] sm:$0xff] %vm284_vm0, %v235_v12  ;;  %v173_v20 = vadd.f32 %v386_v2, %v102_v13  ;;  %v174_v21 = vadd.f32 %v386_v2, %v103_v14  ;;  %v175_v22 = vadd.f32 %v386_v2, %v104_v15  ;;  %v236_v25 = vmax.f32 %v172_v16, 0.0  ;;  %v52_v8 = vld [vmem:[%s961_s0 + $0x130] sm:$0xff]  ;;  %v53_v13 = vld [vmem:[%s961_s0 + $0x138] sm:$0xff] }
  0x13   :  { %v108_v23 = vmul.f32 %v381_v1, %v37_v11  ;;  %v176_v26 = vadd.f32 %v386_v2, %v105_v17  ;;  %v177_v27 = vadd.f32 %v386_v2, %v106_v18  ;;  %v178_v28 = vadd.f32 %v386_v2, %v107_v19 }
  0x14   :  { %v237_v32 = vmax.f32 %v173_v20, 0.0  ;;  %v238_v33 = vmax.f32 %v174_v21, 0.0  ;;  %v239_v34 = vmax.f32 %v175_v22, 0.0  ;;  %301 = vst.msk [vmem:[%s964_s3 + $0x80] sm:$0xff] %vm284_vm0, %v236_v25  ;;  %v109_v42 = vmul.f32 %v381_v1, %v38_v24 }
  0x15   :  { %v179_v35 = vadd.f32 %v386_v2, %v108_v23  ;;  %v240_v39 = vmax.f32 %v176_v26, 0.0  ;;  %v241_v40 = vmax.f32 %v177_v27, 0.0  ;;  %v242_v41 = vmax.f32 %v178_v28, 0.0  ;;  %v54_v26 = vld [vmem:[%s961_s0 + $0x140] sm:$0xff] }
  0x16   :  { %302 = vst.msk [vmem:[%s964_s3 + $0x88] sm:$0xff] %vm284_vm0, %v237_v32  ;;  %303 = vst.msk [vmem:[%s964_s3 + $0x90] sm:$0xff] %vm284_vm0, %v238_v33  ;;  %v110_v45 = vmul.f32 %v381_v1, %v39_v29  ;;  %v111_v46 = vmul.f32 %v381_v1, %v40_v30  ;;  %v112_v47 = vmul.f32 %v381_v1, %v41_v31  ;;  %v55_v31 = vld [vmem:[%s961_s0 + $0x148] sm:$0xff]  ;;  %v56_v32 = vld [vmem:[%s961_s0 + $0x150] sm:$0xff] }
  0x17   :  { %304 = vst.msk [vmem:[%s964_s3 + $0x98] sm:$0xff] %vm284_vm0, %v239_v34  ;;  %v243_v44 = vmax.f32 %v179_v35, 0.0  ;;  %305 = vst.msk [vmem:[%s964_s3 + $0xa0] sm:$0xff] %vm284_vm0, %v240_v39  ;;  %v180_v48 = vadd.f32 %v386_v2, %v109_v42  ;;  %v113_v49 = vmul.f32 %v381_v1, %v42_v36  ;;  %v114_v50 = vmul.f32 %v381_v1, %v43_v37  ;;  %v57_v33 = vld [vmem:[%s961_s0 + $0x158] sm:$0xff]  ;;  %v59_v39 = vld [vmem:[%s961_s0 + $0x168] sm:$0xff] }
  0x18   :  { %306 = vst.msk [vmem:[%s964_s3 + $0xa8] sm:$0xff] %vm284_vm0, %v241_v40  ;;  %307 = vst.msk [vmem:[%s964_s3 + $0xb0] sm:$0xff] %vm284_vm0, %v242_v41  ;;  %v115_v51 = vmul.f32 %v381_v1, %v44_v38  ;;  %v181_v52 = vadd.f32 %v386_v2, %v110_v45  ;;  %v182_v53 = vadd.f32 %v386_v2, %v111_v46  ;;  %v58_v38 = vld [vmem:[%s961_s0 + $0x160] sm:$0xff]  ;;  %v60_v40 = vld [vmem:[%s961_s0 + $0x170] sm:$0xff] }
  0x19   :  { %308 = vst.msk [vmem:[%s964_s3 + $0xb8] sm:$0xff] %vm284_vm0, %v243_v44  ;;  %v183_v54 = vadd.f32 %v386_v2, %v112_v47  ;;  %v116_v55 = vmul.f32 %v381_v1, %v45_v43  ;;  %v244_v57 = vmax.f32 %v180_v48, 0.0  ;;  %v184_v58 = vadd.f32 %v386_v2, %v113_v49  ;;  %v61_v45 = vld [vmem:[%s961_s0 + $0x178] sm:$0xff] }
  0x1a   :  { %v185_v59 = vadd.f32 %v386_v2, %v114_v50  ;;  %v186_v60 = vadd.f32 %v386_v2, %v115_v51  ;;  %v245_v0 = vmax.f32 %v181_v52, 0.0  ;;  %v246_v3 = vmax.f32 %v182_v53, 0.0 }
  0x1b   :  { %v247_v4 = vmax.f32 %v183_v54, 0.0  ;;  %v187_v5 = vadd.f32 %v386_v2, %v116_v55  ;;  %309 = vst.msk [vmem:[%s964_s3 + $0xc0] sm:$0xff] %vm284_vm0, %v244_v57  ;;  %v248_v9 = vmax.f32 %v184_v58, 0.0  ;;  %v117_v12 = vmul.f32 %v381_v1, %v46_v56  ;;  %v62_v58 = vld [vmem:[%s961_s0 + $0x180] sm:$0xff] }
  0x1c   :  { %v249_v10 = vmax.f32 %v185_v59, 0.0  ;;  %v250_v11 = vmax.f32 %v186_v60, 0.0  ;;  %310 = vst.msk [vmem:[%s964_s3 + $0xc8] sm:$0xff] %vm284_vm0, %v245_v0  ;;  %311 = vst.msk [vmem:[%s964_s3 + $0xd0] sm:$0xff] %vm284_vm0, %v246_v3  ;;  %v118_v15 = vmul.f32 %v381_v1, %v47_v61  ;;  %v119_v16 = vmul.f32 %v381_v1, %v48_v62  ;;  %v64_v0 = vld [vmem:[%s961_s0 + $0x190] sm:$0xff]  ;;  %v65_v3 = vld [vmem:[%s961_s0 + $0x198] sm:$0xff] }
  0x1d   :  { %312 = vst.msk [vmem:[%s964_s3 + $0xd8] sm:$0xff] %vm284_vm0, %v247_v4  ;;  %v251_v14 = vmax.f32 %v187_v5, 0.0  ;;  %v120_v17 = vmul.f32 %v381_v1, %v49_v63  ;;  %313 = vst.msk [vmem:[%s964_s3 + $0xe0] sm:$0xff] %vm284_vm0, %v248_v9  ;;  %v188_v18 = vadd.f32 %v386_v2, %v117_v12  ;;  %v121_v19 = vmul.f32 %v381_v1, %v50_v6  ;;  %v63_v63 = vld [vmem:[%s961_s0 + $0x188] sm:$0xff] }
  0x1e   :  { %314 = vst.msk [vmem:[%s964_s3 + $0xe8] sm:$0xff] %vm284_vm0, %v249_v10  ;;  %315 = vst.msk [vmem:[%s964_s3 + $0xf0] sm:$0xff] %vm284_vm0, %v250_v11  ;;  %v122_v20 = vmul.f32 %v381_v1, %v51_v7  ;;  %v123_v21 = vmul.f32 %v381_v1, %v52_v8  ;;  %v189_v22 = vadd.f32 %v386_v2, %v118_v15  ;;  %v66_v8 = vld [vmem:[%s961_s0 + $0x1a0] sm:$0xff]  ;;  %v67_v9 = vld [vmem:[%s961_s0 + $0x1a8] sm:$0xff] }
  0x1f   :  { %316 = vst.msk [vmem:[%s964_s3 + $0xf8] sm:$0xff] %vm284_vm0, %v251_v14  ;;  %v190_v23 = vadd.f32 %v386_v2, %v119_v16  ;;  %v191_v24 = vadd.f32 %v386_v2, %v120_v17  ;;  %v124_v25 = vmul.f32 %v381_v1, %v53_v13  ;;  %v252_v27 = vmax.f32 %v188_v18, 0.0  ;;  %v68_v10 = vld [vmem:[%s961_s0 + $0x1b0] sm:$0xff]  ;;  %v69_v15 = vld [vmem:[%s961_s0 + $0x1b8] sm:$0xff] }
  0x20   :  { %v192_v28 = vadd.f32 %v386_v2, %v121_v19  ;;  %v193_v29 = vadd.f32 %v386_v2, %v122_v20  ;;  %v194_v30 = vadd.f32 %v386_v2, %v123_v21  ;;  %v253_v34 = vmax.f32 %v189_v22, 0.0 }
  0x21   :  { %v254_v35 = vmax.f32 %v190_v23, 0.0  ;;  %v255_v36 = vmax.f32 %v191_v24, 0.0  ;;  %v195_v37 = vadd.f32 %v386_v2, %v124_v25  ;;  %317 = vst.msk [vmem:[%s964_s3 + $0x100] sm:$0xff] %vm284_vm0, %v252_v27  ;;  %v125_v44 = vmul.f32 %v381_v1, %v54_v26 }
  0x22   :  { %v256_v41 = vmax.f32 %v192_v28, 0.0  ;;  %v257_v42 = vmax.f32 %v193_v29, 0.0  ;;  %v258_v43 = vmax.f32 %v194_v30, 0.0  ;;  %318 = vst.msk [vmem:[%s964_s3 + $0x108] sm:$0xff] %vm284_vm0, %v253_v34  ;;  %v126_v47 = vmul.f32 %v381_v1, %v55_v31  ;;  %v70_v28 = vld [vmem:[%s961_s0 + $0x1c0] sm:$0xff]  ;;  %v72_v34 = vld [vmem:[%s961_s0 + $0x1d0] sm:$0xff] }
  0x23   :  { %319 = vst.msk [vmem:[%s964_s3 + $0x110] sm:$0xff] %vm284_vm0, %v254_v35  ;;  %320 = vst.msk [vmem:[%s964_s3 + $0x118] sm:$0xff] %vm284_vm0, %v255_v36  ;;  %v259_v46 = vmax.f32 %v195_v37, 0.0  ;;  %v127_v48 = vmul.f32 %v381_v1, %v56_v32  ;;  %v128_v49 = vmul.f32 %v381_v1, %v57_v33  ;;  %v196_v50 = vadd.f32 %v386_v2, %v125_v44  ;;  %v71_v33 = vld [vmem:[%s961_s0 + $0x1c8] sm:$0xff]  ;;  %v73_v35 = vld [vmem:[%s961_s0 + $0x1d8] sm:$0xff] }
  0x24   :  { %321 = vst.msk [vmem:[%s964_s3 + $0x120] sm:$0xff] %vm284_vm0, %v256_v41  ;;  %322 = vst.msk [vmem:[%s964_s3 + $0x128] sm:$0xff] %vm284_vm0, %v257_v42  ;;  %v129_v51 = vmul.f32 %v381_v1, %v58_v38  ;;  %v130_v52 = vmul.f32 %v381_v1, %v59_v39  ;;  %v131_v53 = vmul.f32 %v381_v1, %v60_v40  ;;  %v74_v40 = vld [vmem:[%s961_s0 + $0x1e0] sm:$0xff]  ;;  %v75_v41 = vld [vmem:[%s961_s0 + $0x1e8] sm:$0xff] }
  0x25   :  { %323 = vst.msk [vmem:[%s964_s3 + $0x130] sm:$0xff] %vm284_vm0, %v258_v43  ;;  %324 = vst.msk [vmem:[%s964_s3 + $0x138] sm:$0xff] %vm284_vm0, %v259_v46  ;;  %v197_v54 = vadd.f32 %v386_v2, %v126_v47  ;;  %v198_v55 = vadd.f32 %v386_v2, %v127_v48  ;;  %v199_v56 = vadd.f32 %v386_v2, %v128_v49  ;;  %v260_v59 = vmax.f32 %v196_v50, 0.0  ;;  %v76_v42 = vld [vmem:[%s961_s0 + $0x1f0] sm:$0xff]  ;;  %v77_v47 = vld [vmem:[%s961_s0 + $0x1f8] sm:$0xff] }
  0x26   :  { %v132_v57 = vmul.f32 %v381_v1, %v61_v45  ;;  %v200_v60 = vadd.f32 %v386_v2, %v129_v51  ;;  %v201_v61 = vadd.f32 %v386_v2, %v130_v52  ;;  %v202_v62 = vadd.f32 %v386_v2, %v131_v53 }
  0x27   :  { %v261_v4 = vmax.f32 %v197_v54, 0.0  ;;  %v262_v5 = vmax.f32 %v198_v55, 0.0  ;;  %v263_v6 = vmax.f32 %v199_v56, 0.0  ;;  %325 = vst.msk [vmem:[%s964_s3 + $0x140] sm:$0xff] %vm284_vm0, %v260_v59  ;;  %v133_v14 = vmul.f32 %v381_v1, %v62_v58 }
  0x28   :  { %v203_v7 = vadd.f32 %v386_v2, %v132_v57  ;;  %v264_v11 = vmax.f32 %v200_v60, 0.0  ;;  %v265_v12 = vmax.f32 %v201_v61, 0.0  ;;  %v266_v13 = vmax.f32 %v202_v62, 0.0 }
  0x29   :  { %326 = vst.msk [vmem:[%s964_s3 + $0x148] sm:$0xff] %vm284_vm0, %v261_v4  ;;  %327 = vst.msk [vmem:[%s964_s3 + $0x150] sm:$0xff] %vm284_vm0, %v262_v5  ;;  %v134_v17 = vmul.f32 %v381_v1, %v63_v63  ;;  %v135_v18 = vmul.f32 %v381_v1, %v64_v0  ;;  %v136_v19 = vmul.f32 %v381_v1, %v65_v3 }
  0x2a   :  { %328 = vst.msk [vmem:[%s964_s3 + $0x158] sm:$0xff] %vm284_vm0, %v263_v6  ;;  %v267_v16 = vmax.f32 %v203_v7, 0.0  ;;  %329 = vst.msk [vmem:[%s964_s3 + $0x160] sm:$0xff] %vm284_vm0, %v264_v11  ;;  %v204_v20 = vadd.f32 %v386_v2, %v133_v14  ;;  %v137_v21 = vmul.f32 %v381_v1, %v66_v8  ;;  %v138_v22 = vmul.f32 %v381_v1, %v67_v9 }
  0x2b   :  { %330 = vst.msk [vmem:[%s964_s3 + $0x168] sm:$0xff] %vm284_vm0, %v265_v12  ;;  %331 = vst.msk [vmem:[%s964_s3 + $0x170] sm:$0xff] %vm284_vm0, %v266_v13  ;;  %v139_v23 = vmul.f32 %v381_v1, %v68_v10  ;;  %v205_v24 = vadd.f32 %v386_v2, %v134_v17  ;;  %v206_v25 = vadd.f32 %v386_v2, %v135_v18 }
  0x2c   :  { %332 = vst.msk [vmem:[%s964_s3 + $0x178] sm:$0xff] %vm284_vm0, %v267_v16  ;;  %v207_v26 = vadd.f32 %v386_v2, %v136_v19  ;;  %v140_v27 = vmul.f32 %v381_v1, %v69_v15  ;;  %v268_v29 = vmax.f32 %v204_v20, 0.0  ;;  %v208_v30 = vadd.f32 %v386_v2, %v137_v21 }
  0x2d   :  { %v209_v31 = vadd.f32 %v386_v2, %v138_v22  ;;  %v210_v32 = vadd.f32 %v386_v2, %v139_v23  ;;  %v269_v36 = vmax.f32 %v205_v24, 0.0  ;;  %v270_v37 = vmax.f32 %v206_v25, 0.0 }
  0x2e   :  { %v271_v38 = vmax.f32 %v207_v26, 0.0  ;;  %v211_v39 = vadd.f32 %v386_v2, %v140_v27  ;;  %333 = vst.msk [vmem:[%s964_s3 + $0x180] sm:$0xff] %vm284_vm0, %v268_v29  ;;  %v272_v43 = vmax.f32 %v208_v30, 0.0  ;;  %v141_v46 = vmul.f32 %v381_v1, %v70_v28 }
  0x2f   :  { %v273_v44 = vmax.f32 %v209_v31, 0.0  ;;  %v274_v45 = vmax.f32 %v210_v32, 0.0  ;;  %334 = vst.msk [vmem:[%s964_s3 + $0x188] sm:$0xff] %vm284_vm0, %v269_v36  ;;  %335 = vst.msk [vmem:[%s964_s3 + $0x190] sm:$0xff] %vm284_vm0, %v270_v37  ;;  %v142_v49 = vmul.f32 %v381_v1, %v71_v33  ;;  %v143_v50 = vmul.f32 %v381_v1, %v72_v34 }
  0x30   :  { %336 = vst.msk [vmem:[%s964_s3 + $0x198] sm:$0xff] %vm284_vm0, %v271_v38  ;;  %v275_v48 = vmax.f32 %v211_v39, 0.0  ;;  %v144_v51 = vmul.f32 %v381_v1, %v73_v35  ;;  %337 = vst.msk [vmem:[%s964_s3 + $0x1a0] sm:$0xff] %vm284_vm0, %v272_v43  ;;  %v212_v52 = vadd.f32 %v386_v2, %v141_v46  ;;  %v145_v53 = vmul.f32 %v381_v1, %v74_v40 }
  0x31   :  { %338 = vst.msk [vmem:[%s964_s3 + $0x1a8] sm:$0xff] %vm284_vm0, %v273_v44  ;;  %339 = vst.msk [vmem:[%s964_s3 + $0x1b0] sm:$0xff] %vm284_vm0, %v274_v45  ;;  %v146_v54 = vmul.f32 %v381_v1, %v75_v41  ;;  %v147_v55 = vmul.f32 %v381_v1, %v76_v42  ;;  %v213_v56 = vadd.f32 %v386_v2, %v142_v49 }
  0x32   :  { %340 = vst.msk [vmem:[%s964_s3 + $0x1b8] sm:$0xff] %vm284_vm0, %v275_v48  ;;  %v214_v57 = vadd.f32 %v386_v2, %v143_v50  ;;  %v215_v58 = vadd.f32 %v386_v2, %v144_v51  ;;  %v148_v59 = vmul.f32 %v381_v1, %v77_v47  ;;  %v276_v60 = vmax.f32 %v212_v52, 0.0 }
  0x33   :  { %v216_v61 = vadd.f32 %v386_v2, %v145_v53  ;;  %v217_v62 = vadd.f32 %v386_v2, %v146_v54  ;;  %v218_v63 = vadd.f32 %v386_v2, %v147_v55  ;;  %v277_v0 = vmax.f32 %v213_v56, 0.0 }
  0x34   :  { %v278_v3 = vmax.f32 %v214_v57, 0.0  ;;  %v279_v4 = vmax.f32 %v215_v58, 0.0  ;;  %v219_v5 = vadd.f32 %v386_v2, %v148_v59  ;;  %341 = vst.msk [vmem:[%s964_s3 + $0x1c0] sm:$0xff] %vm284_vm0, %v276_v60 }
  0x35   :  { %v280_v6 = vmax.f32 %v216_v61, 0.0  ;;  %v281_v7 = vmax.f32 %v217_v62, 0.0  ;;  %v282_v1 = vmax.f32 %v218_v63, 0.0  ;;  %342 = vst.msk [vmem:[%s964_s3 + $0x1c8] sm:$0xff] %vm284_vm0, %v277_v0 }
  0x36   :  { %343 = vst.msk [vmem:[%s964_s3 + $0x1d0] sm:$0xff] %vm284_vm0, %v278_v3  ;;  %344 = vst.msk [vmem:[%s964_s3 + $0x1d8] sm:$0xff] %vm284_vm0, %v279_v4  ;;  %v283_v2 = vmax.f32 %v219_v5, 0.0 }
  0x37   :  { %345 = vst.msk [vmem:[%s964_s3 + $0x1e0] sm:$0xff] %vm284_vm0, %v280_v6  ;;  %346 = vst.msk [vmem:[%s964_s3 + $0x1e8] sm:$0xff] %vm284_vm0, %v281_v7 }
  0x38   :  { %347 = vst.msk [vmem:[%s964_s3 + $0x1f0] sm:$0xff] %vm284_vm0, %v282_v1  ;;  %348 = vst.msk [vmem:[%s964_s3 + $0x1f8] sm:$0xff] %vm284_vm0, %v283_v2 }

// kernel: upsampler_block.2
= control target key start
LH: loop header
LB: loop body
LE: loop exit
PB: predicated region body
PF: predicated region fallthrough
CT: control target
= control target key end

     0   :  { %s2698_s15 = smov 0   ;;  %s3689_s0 = inlined_call_operand.vmem [shape: bf16[2,256,4], index: 0, kind: input, shape index: {}]   ;;  %s3690_s1 = inlined_call_operand.vmem [shape: bf16[4,4,32], index: 1, kind: input, shape index: {}]   ;;  %s3691_s2 = inlined_call_operand.vmem [shape: f32[1,32], index: 2, kind: input, shape index: {}]   ;;  %s3692_s3 = inlined_call_operand.vmem [shape: f32[2,256,32], index: 3, kind: output, shape index: {0}]   ;;  %s3693_s4 = inlined_call_operand.vmem [shape: f32[2,2,32], index: 4, kind: output, shape index: {1}]  }
   0x1 LB: > { %s2333_s16 = sadd.s32 4294967295, %s2670_s15   ;;  %p2337_p0 = scmp.ge.s32.totalorder %s2670_s15, 1  ;;  %s2670_s15 = sphi %s2698_s15, %s15_s15  }
   0x2   : > { %p165_p1 = scmp.lt.s32.totalorder %s2670_s15, 3 }
   0x4   : > { %p166_p2 = pnand %p2337_p0, %p165_p1 }
   0x6   : > { %169 = sbr.rel (%p166_p2) target bundleno = 381 (0x17d), region = 32 }
   0xb   : > { %v953_v0 = vld [vmem:[%s3690_s1] sm:$0x3]  ;;  %vm1020_vm0 = vcmask 1041408   ;;  %v2343_v1 = vld [vmem:[%s3690_s1 + $0x2] sm:$0x3]  ;;  %p195_p3 = scmp.lt.s32.totalorder %s2333_s16, 1  ;;  %v310_v2 = vlaneseq }
   0xc   : > { %2636 = vmatprep.subr.msk.bf16.mxu1 %vm1020_vm0, %v953_v0  ;;  %v1314_v3 = vsel %vm1020_vm0, %v953_v0, 0  ;;  %2635 = vmatprep.subr.msk.bf16.mxu0 %vm1020_vm0, %v2343_v1  ;;  %vm274_vm1 = vcmask 31744   ;;  %v1022_v4 = vsel %vm1020_vm0, %v2343_v1, 0  ;;  %v2719_v5 = vld [vmem:[%s3690_s1 + $0x4] sm:$0x3]  ;;  %v2672_v8 = vmov 0.0  }
   0xd   : > { %2534 = vmatpush3.bf16.msra.mxu1 %v1314_v3  ;;  %s3753_s16 = smov (!%p195_p3, %s2333_s16), 1  ;;  %2500 = vmatpush3.bf16.msra.mxu0 %v1022_v4  ;;  %v2723_v6 = vshrl.u32 %v310_v2, 7  ;;  %v2409_v7 = vld [vmem:[%s3690_s1 + $0x6] sm:$0x3]  ;;  %307 = vst.msk [vmem:[#allocation2 + $0x100] sm:$0xff] %vm274_vm1, %v2672_v8  ;;  %308 = vst.msk [vmem:[#allocation2 + $0x108] sm:$0xff] %vm274_vm1, %v2672_v8 }
   0xe   : > { %309 = vst.msk [vmem:[#allocation2 + $0x110] sm:$0xff] %vm274_vm1, %v2672_v8  ;;  %2637 = vmatprep.subr.msk.bf16.mxu0 %vm1020_vm0, %v2719_v5  ;;  %2638 = vmatprep.subr.msk.bf16.mxu1 %vm1020_vm0, %v2409_v7  ;;  %s2429_s25 = sshll.u32 %s3753_s16, 7  ;;  %v1806_v14 = vsel %vm1020_vm0, %v2409_v7, 0  ;;  %v1544_v62 = vsel %vm1020_vm0, %v2719_v5, 0  ;;  %s2430_s29 = sshll.u32 %s3753_s16, 8 }
   0xf   : > { %s2738_s28 = scalar_lea.vmem %s3689_s0, %s2429_s25  ;;  %v312_v9 = vadd.s32 8, %v2723_v6  ;;  %v314_v13 = vadd.s32 24, %v2723_v6  ;;  %v316_v15 = vadd.s32 40, %v2723_v6  ;;  %v318_v32 = vadd.s32 56, %v2723_v6  ;;  %s3363_s8 = scalar_lea.vmem %s3692_s3, %s2430_s29 }
  0x10   : > { %v210_v10 = vld [vmem:[%s2738_s28] sm:$0xff]   ;;  %v212_v11 = vld [vmem:[%s2738_s28 + $0x8] sm:$0xff]   ;;  %v214_v12 = vld [vmem:[%s2738_s28 + $0x10] sm:$0xff]   ;;  %v320_v37 = vadd.s32 72, %v2723_v6  ;;  %v322_v4 = vadd.s32 88, %v2723_v6  ;;  %s2342_s9 = sshll.u32 %s3753_s16, 1 }
  0x11   : > { %v242_v16 = vunpack.c.l.bf16 %v210_v10  ;;  %v243_v17 = vunpack.c.h.bf16 %v210_v10  ;;  %v244_v18 = vunpack.c.l.bf16 %v212_v11  ;;  %v2748_v19 = vld [vmem:[%s2738_s28 + $0x18] sm:$0xff]   ;;  %v2751_v20 = vld [vmem:[%s2738_s28 + $0x20] sm:$0xff]   ;;  %v245_v21 = vunpack.c.h.bf16 %v212_v11  ;;  %v2754_v24 = vld [vmem:[%s2738_s28 + $0x28] sm:$0xff]   ;;  %2535 = vmatprep.mubr.msk.bf16.mxu1 %vm274_vm1, %v210_v10  ;;  %s208_s12 = scalar_lea.vmem %s3693_s4, %s2342_s9 }
  0x12   : > { %v246_v22 = vunpack.c.l.bf16 %v214_v12  ;;  %v247_v23 = vunpack.c.h.bf16 %v214_v12  ;;  %v248_v25 = vunpack.c.l.bf16 %v2748_v19  ;;  %v354_v26 = vand.u32 15, %v312_v9  ;;  %v2762_v27 = vld [vmem:[%s2738_s28 + $0x30] sm:$0xff]   ;;  %2536 = vmatmul.mubr.msk.bf16.vlgmr.msra.gmra.mxu1 %vm274_vm1, %v212_v11  ;;  %v2776_v35 = vld [vmem:[%s2738_s28 + $0x38] sm:$0xff]   ;;  %v2784_v39 = vld [vmem:[%s2738_s28 + $0x40] sm:$0xff]  }
  0x13   : > { %275 = vst.msk [vmem:[#allocation2] sm:$0xff] %vm274_vm1, %v242_v16  ;;  %276 = vst.msk [vmem:[#allocation2 + $0x8] sm:$0xff] %vm274_vm1, %v243_v17  ;;  %v368_v28 = vand.u32 15, %v314_v13  ;;  %v249_v29 = vunpack.c.h.bf16 %v2748_v19  ;;  %v250_v30 = vunpack.c.l.bf16 %v2751_v20  ;;  %2602 = vmatpush3.bf16.msra.mxu1 %v1806_v14  ;;  %2539 = vmatprep.mubr.msk.bf16.mxu1 %vm274_vm1, %v214_v12  ;;  %v382_v31 = vand.u32 15, %v316_v15  ;;  %v2794_v42 = vld [vmem:[%s2738_s28 + $0x48] sm:$0xff]   ;;  %v2837_v63 = vld [vmem:[%s2738_s28 + $0x50] sm:$0xff]  }
  0x14   : > { %277 = vst.msk [vmem:[#allocation2 + $0x10] sm:$0xff] %vm274_vm1, %v244_v18  ;;  %278 = vst.msk [vmem:[#allocation2 + $0x18] sm:$0xff] %vm274_vm1, %v245_v21  ;;  %v251_v33 = vunpack.c.h.bf16 %v2751_v20  ;;  %v252_v34 = vunpack.c.l.bf16 %v2754_v24  ;;  %v253_v36 = vunpack.c.h.bf16 %v2754_v24  ;;  %v254_v38 = vunpack.c.l.bf16 %v2762_v27  ;;  %v2862_v10 = vld [vmem:[%s2738_s28 + $0x58] sm:$0xff]   ;;  %v2874_v15 = vld [vmem:[%s2738_s28 + $0x60] sm:$0xff]  }
  0x15   : > { %279 = vst.msk [vmem:[#allocation2 + $0x20] sm:$0xff] %vm274_vm1, %v246_v22  ;;  %280 = vst.msk [vmem:[#allocation2 + $0x28] sm:$0xff] %vm274_vm1, %v247_v23  ;;  %vm2786_vm2 = vcmp.lt.s32.totalorder %v354_v26, 15  ;;  %v255_v41 = vunpack.c.h.bf16 %v2762_v27  ;;  %vm2796_vm3 = vcmp.lt.s32.totalorder %v368_v28, 15  ;;  %v256_v44 = vunpack.c.l.bf16 %v2776_v35  ;;  %v2886_v22 = vld [vmem:[%s2738_s28 + $0x68] sm:$0xff]   ;;  %v2896_v28 = vld [vmem:[%s2738_s28 + $0x70] sm:$0xff]  }
  0x16   : > { %281 = vst.msk [vmem:[#allocation2 + $0x30] sm:$0xff] %vm274_vm1, %v248_v25  ;;  %282 = vst.msk [vmem:[#allocation2 + $0x38] sm:$0xff] %vm274_vm1, %v249_v29  ;;  %v257_v45 = vunpack.c.h.bf16 %v2776_v35  ;;  %vm2804_vm4 = vcmp.lt.s32.totalorder %v382_v31, 15  ;;  %v396_v47 = vand.u32 15, %v318_v32  ;;  %v258_v48 = vunpack.c.l.bf16 %v2784_v39 }
  0x17   : > { %283 = vst.msk [vmem:[#allocation2 + $0x40] sm:$0xff] %vm274_vm1, %v250_v30  ;;  %284 = vst.msk [vmem:[#allocation2 + $0x48] sm:$0xff] %vm274_vm1, %v251_v33  ;;  %v410_v51 = vand.u32 15, %v320_v37  ;;  %v259_v52 = vunpack.c.h.bf16 %v2784_v39  ;;  %v260_v53 = vunpack.c.l.bf16 %v2794_v42  ;;  %v261_v54 = vunpack.c.h.bf16 %v2794_v42  ;;  %v2911_v33 = vld [vmem:[%s2738_s28 + $0x78] sm:$0xff]  }
  0x18   : > { %285 = vst.msk [vmem:[#allocation2 + $0x50] sm:$0xff] %vm274_vm1, %v252_v34  ;;  %286 = vst.msk [vmem:[#allocation2 + $0x58] sm:$0xff] %vm274_vm1, %v253_v36  ;;  %vm2843_vm5 = vcmp.lt.s32.totalorder %v396_v47, 15  ;;  %v324_v9 = vadd.s32 104, %v2723_v6  ;;  %v262_v11 = vunpack.c.l.bf16 %v2837_v63  ;;  %v263_v14 = vunpack.c.h.bf16 %v2837_v63 }
  0x19   : > { %287 = vst.msk [vmem:[#allocation2 + $0x60] sm:$0xff] %vm274_vm1, %v254_v38  ;;  %288 = vst.msk [vmem:[#allocation2 + $0x68] sm:$0xff] %vm274_vm1, %v255_v41  ;;  %vm2854_vm6 = vcmp.lt.s32.totalorder %v410_v51, 15  ;;  %v424_v18 = vand.u32 15, %v322_v4  ;;  %v265_v21 = vunpack.c.h.bf16 %v2862_v10  ;;  %v266_v25 = vunpack.c.l.bf16 %v2874_v15 }
  0x1a   : > { %v759_v49 = vld [vmem:[#allocation2 + $0x1] sm:$0xff]  ;;  %289 = vst.msk [vmem:[#allocation2 + $0x70] sm:$0xff] %vm274_vm1, %v256_v44  ;;  %290 = vst.msk [vmem:[#allocation2 + $0x78] sm:$0xff] %vm274_vm1, %v257_v45  ;;  %2540 = vmatmul.mubr.msk.bf16.gmra.mxu1 %vm274_vm1, %v2748_v19  ;;  %v264_v19 = vunpack.c.l.bf16 %v2862_v10  ;;  %v326_v31 = vadd.s32 120, %v2723_v6  ;;  %v268_v32 = vunpack.c.l.bf16 %v2886_v22  ;;  %v328_v37 = vadd.s32 136, %v2723_v6 }
  0x1b   : > { %v760_v50 = vld [vmem:[#allocation2 + $0x9] sm:$0xff]  ;;  %v2815_v55 = vld [vmem:[#allocation2 + $0x11] sm:$0xff]  ;;  %291 = vst.msk [vmem:[#allocation2 + $0x80] sm:$0xff] %vm274_vm1, %v258_v48  ;;  %292 = vst.msk [vmem:[#allocation2 + $0x88] sm:$0xff] %vm274_vm1, %v259_v52  ;;  %2543 = vmatprep.mubr.msk.bf16.mxu1 %vm274_vm1, %v2751_v20  ;;  %v438_v20 = vand.u32 15, %v324_v9  ;;  %vm2898_vm7 = vcmp.lt.s32.totalorder %v424_v18, 15  ;;  %v270_v38 = vunpack.c.l.bf16 %v2896_v28  ;;  %v271_v41 = vunpack.c.h.bf16 %v2896_v28 }
  0x1c   : > { %v2817_v56 = vld [vmem:[#allocation2 + $0x19] sm:$0xff]  ;;  %v856_v57 = vsel %vm2786_vm2, %v760_v50, 0.0  ;;  %v2821_v58 = vld [vmem:[#allocation2 + $0x21] sm:$0xff]  ;;  %293 = vst.msk [vmem:[#allocation2 + $0x90] sm:$0xff] %vm274_vm1, %v260_v53  ;;  %294 = vst.msk [vmem:[#allocation2 + $0x98] sm:$0xff] %vm274_vm1, %v261_v54  ;;  %v272_v47 = vunpack.c.l.bf16 %v2911_v33  ;;  %v273_v48 = vunpack.c.h.bf16 %v2911_v33  ;;  %v452_v51 = vand.u32 15, %v326_v31 }
  0x1d   : > { %v2824_v59 = vld [vmem:[#allocation2 + $0x29] sm:$0xff]  ;;  %v858_v60 = vsel %vm2796_vm3, %v2817_v56, 0.0  ;;  %v954_v61 = vpack.c.bf16 %v856_v57, %v759_v49  ;;  %v2867_v12 = vld [vmem:[#allocation2 + $0x31] sm:$0xff]  ;;  %295 = vst.msk [vmem:[#allocation2 + $0xa0] sm:$0xff] %vm274_vm1, %v262_v11  ;;  %296 = vst.msk [vmem:[#allocation2 + $0xa8] sm:$0xff] %vm274_vm1, %v263_v14  ;;  %vm2913_vm8 = vcmp.lt.s32.totalorder %v438_v20, 15 }
  0x1e   : > { %v955_v0 = vpack.c.bf16 %v858_v60, %v2815_v55  ;;  %v860_v1 = vsel %vm2804_vm4, %v2824_v59, 0.0  ;;  %v2847_v3 = vld [vmem:[#allocation2 + $0x39] sm:$0xff]  ;;  %v2876_v16 = vld [vmem:[#allocation2 + $0x41] sm:$0xff]  ;;  %297 = vst.msk [vmem:[#allocation2 + $0xb0] sm:$0xff] %vm274_vm1, %v264_v19  ;;  %298 = vst.msk [vmem:[#allocation2 + $0xb8] sm:$0xff] %vm274_vm1, %v265_v21  ;;  %v466_v52 = vand.u32 15, %v328_v37 }
  0x1f   : > { %2501 = vmatprep.mubr.msk.bf16.mxu0 %vm274_vm1, %v954_v61  ;;  %v956_v5 = vpack.c.bf16 %v860_v1, %v2821_v58  ;;  %v2858_v8 = vld [vmem:[#allocation2 + $0x49] sm:$0xff]  ;;  %v862_v13 = vsel %vm2843_vm5, %v2847_v3, 0.0  ;;  %299 = vst.msk [vmem:[#allocation2 + $0xc0] sm:$0xff] %vm274_vm1, %v266_v25  ;;  %301 = vst.msk [vmem:[#allocation2 + $0xd0] sm:$0xff] %vm274_vm1, %v268_v32  ;;  %v2927_v44 = vld [vmem:[#allocation2 + $0x51] sm:$0xff]  ;;  %vm2948_vm9 = vcmp.lt.s32.totalorder %v452_v51, 15 }
  0x20   : > { %2502 = vmatmul.mubr.msk.bf16.vlgmr.msra.gmra.mxu0 %vm274_vm1, %v955_v0  ;;  %v864_v17 = vsel %vm2854_vm6, %v2858_v8, 0.0  ;;  %v957_v23 = vpack.c.bf16 %v862_v13, %v2867_v12  ;;  %v2902_v30 = vld [vmem:[#allocation2 + $0x59] sm:$0xff]  ;;  %v2935_v49 = vld [vmem:[#allocation2 + $0x61] sm:$0xff]  ;;  %303 = vst.msk [vmem:[#allocation2 + $0xe0] sm:$0xff] %vm274_vm1, %v270_v38  ;;  %304 = vst.msk [vmem:[#allocation2 + $0xe8] sm:$0xff] %vm274_vm1, %v271_v41  ;;  %v330_v61 = vadd.s32 152, %v2723_v6 }
  0x21   : > { %2568 = vmatpush3.bf16.msra.mxu0 %v1544_v62  ;;  %2505 = vmatprep.mubr.msk.bf16.mxu0 %vm274_vm1, %v956_v5  ;;  %v958_v26 = vpack.c.bf16 %v864_v17, %v2876_v16  ;;  %v2917_v36 = vld [vmem:[#allocation2 + $0x69] sm:$0xff]  ;;  %v866_v45 = vsel %vm2898_vm7, %v2902_v30, 0.0  ;;  %305 = vst.msk [vmem:[#allocation2 + $0xf0] sm:$0xff] %vm274_vm1, %v272_v47  ;;  %306 = vst.msk [vmem:[#allocation2 + $0xf8] sm:$0xff] %vm274_vm1, %v273_v48  ;;  %vm2957_vm10 = vcmp.lt.s32.totalorder %v466_v52, 15  ;;  %v2966_v1 = vld [vmem:[#allocation2 + $0x71] sm:$0xff] }
  0x22   : > { %2544 = vmatmul.mubr.msk.bf16.gmra.mxu1 %vm274_vm1, %v2754_v24  ;;  %v267_v24 = vunpack.c.h.bf16 %v2874_v15  ;;  %v868_v50 = vsel %vm2913_vm8, %v2917_v36, 0.0  ;;  %v959_v53 = vpack.c.bf16 %v866_v45, %v2927_v44  ;;  %v2952_v60 = vld [vmem:[#allocation2 + $0x79] sm:$0xff]  ;;  %v2971_v4 = vld [vmem:[#allocation2 + $0x81] sm:$0xff]  ;;  %v480_v9 = vand.u32 15, %v330_v61 }
  0x23   : > { %2547 = vmatprep.mubr.msk.bf16.mxu1 %vm274_vm1, %v2762_v27  ;;  %v269_v27 = vunpack.c.h.bf16 %v2886_v22  ;;  %v960_v54 = vpack.c.bf16 %v868_v50, %v2935_v49  ;;  %v2961_v0 = vld [vmem:[#allocation2 + $0x89] sm:$0xff]  ;;  %v334_v19 = vadd.s32 184, %v2723_v6  ;;  %v338_v41 = vadd.s32 216, %v2723_v6 }
  0x24   : > { %300 = vst.msk [vmem:[#allocation2 + $0xc8] sm:$0xff] %vm274_vm1, %v267_v24  ;;  %v872_v5 = vsel %vm2957_vm10, %v2961_v0, 0.0  ;;  %vm2980_vm11 = vcmp.lt.s32.totalorder %v480_v9, 15  ;;  %v2984_v18 = vld [vmem:[#allocation2 + $0x99] sm:$0xff]  ;;  %v3003_v25 = vld [vmem:[#allocation2 + $0xa1] sm:$0xff]  ;;  %v922_v9 = vsel %vm2786_vm2, %v2817_v56, 0.0 }
  0x25   : > { %302 = vst.msk [vmem:[#allocation2 + $0xd8] sm:$0xff] %vm274_vm1, %v269_v27  ;;  %v962_v14 = vpack.c.bf16 %v872_v5, %v2971_v4  ;;  %v2993_v21 = vld [vmem:[#allocation2 + $0xa9] sm:$0xff]  ;;  %v508_v31 = vand.u32 15, %v334_v19  ;;  %v3030_v48 = vld [vmem:[#allocation2 + $0xb1] sm:$0xff]  ;;  %v536_v52 = vand.u32 15, %v338_v41  ;;  %v342_v5 = vadd.s32 248, %v2723_v6 }
  0x26   : > { %v3016_v38 = vld [vmem:[#allocation2 + $0xb9] sm:$0xff]  ;;  %v932_v7 = vsel %vm2898_vm7, %v2917_v36, 0.0  ;;  %v936_v34 = vsel %vm2948_vm9, %v2961_v0, 0.0  ;;  %v938_v36 = vsel %vm2957_vm10, %v2984_v18, 0.0  ;;  %v940_v62 = vsel %vm2980_vm11, %v2993_v21, 0.0 }
  0x27   : > { %vm3012_vm13 = vcmp.lt.s32.totalorder %v508_v31, 15  ;;  %vm3044_vm15 = vcmp.lt.s32.totalorder %v536_v52, 15  ;;  %v3070_v40 = vld [vmem:[#allocation2 + $0xe1] sm:$0xff]  ;;  %v926_v31 = vsel %vm2804_vm4, %v2847_v3, 0.0  ;;  %v930_v3 = vsel %vm2854_vm6, %v2902_v30, 0.0  ;;  %v892_v52 = vld [vmem:[#allocation2 + $0x38] sm:$0xff] }
  0x28   : > { %2506 = vmatmul.mubr.msk.bf16.gmra.mxu0 %vm274_vm1, %v957_v23  ;;  %v2998_v23 = vld [vmem:[#allocation2 + $0x91] sm:$0xff]  ;;  %v894_v30 = vld [vmem:[#allocation2 + $0x48] sm:$0xff]  ;;  %vm2245_vm4 = vcmask 254976  }
  0x29   : > { %2509 = vmatprep.mubr.msk.bf16.mxu0 %vm274_vm1, %v958_v26  ;;  %v3095_v43 = vld [vmem:[#allocation2 + $0xf1] sm:$0xff] }
  0x2a   : > { %2548 = vmatmul.mubr.msk.bf16.gmra.mxu1 %vm274_vm1, %v2776_v35  ;;  %v332_v35 = vadd.s32 168, %v2723_v6 }
  0x2b   : > { %2551 = vmatprep.mubr.msk.bf16.mxu1 %vm274_vm1, %v2784_v39  ;;  %v870_v39 = vsel %vm2948_vm9, %v2952_v60, 0.0  ;;  %v3025_v47 = vld [vmem:[#allocation2 + $0xc9] sm:$0xff]  ;;  %v3035_v50 = vld [vmem:[#allocation2 + $0xc1] sm:$0xff] }
  0x2c   : > { %v494_v11 = vand.u32 15, %v332_v35  ;;  %v961_v13 = vpack.c.bf16 %v870_v39, %v2966_v1  ;;  %v3048_v39 = vld [vmem:[#allocation2 + $0xd9] sm:$0xff]  ;;  %v944_v20 = vsel %vm3012_vm13, %v3025_v47, 0.0 }
  0x2e   : > { %vm2989_vm12 = vcmp.lt.s32.totalorder %v494_v11, 15  ;;  %v919_v11 = vld [vmem:[#allocation2 + $0x101] sm:$0xff] }
  0x2f   : > { %v876_v26 = vsel %vm2989_vm12, %v2993_v21, 0.0  ;;  %v942_v0 = vsel %vm2989_vm12, %v3016_v38, 0.0 }
  0x30   : > { %2510 = vmatmul.mubr.msk.bf16.gmra.mxu0 %vm274_vm1, %v959_v53  ;;  %v964_v37 = vpack.c.bf16 %v876_v26, %v3003_v25  ;;  %v3086_v26 = vld [vmem:[#allocation2 + $0xf9] sm:$0xff] }
  0x31   : > { %2513 = vmatprep.mubr.msk.bf16.mxu0 %vm274_vm1, %v960_v54 }
  0x32   : > { %2552 = vmatmul.mubr.msk.bf16.gmra.mxu1 %vm274_vm1, %v2794_v42  ;;  %v336_v42 = vadd.s32 200, %v2723_v6 }
  0x33   : > { %2555 = vmatprep.mubr.msk.bf16.mxu1 %vm274_vm1, %v2837_v63  ;;  %v874_v63 = vsel %vm2980_vm11, %v2984_v18, 0.0  ;;  %v902_v18 = vld [vmem:[#allocation2 + $0x88] sm:$0xff] }
  0x34   : > { %v522_v24 = vand.u32 15, %v336_v42  ;;  %v963_v32 = vpack.c.bf16 %v874_v63, %v2998_v23  ;;  %v924_v63 = vsel %vm2796_vm3, %v2824_v59, 0.0  ;;  %vm2243_vm3 = vcmask 1040384  }
  0x36   : > { %vm3021_vm14 = vcmp.lt.s32.totalorder %v522_v24, 15  ;;  %v887_v24 = vld [vmem:[#allocation2 + $0x10] sm:$0xff] }
  0x37   : > { %v880_v51 = vsel %vm3021_vm14, %v3025_v47, 0.0  ;;  %v946_v21 = vsel %vm3021_vm14, %v3048_v39, 0.0 }
  0x38   : > { %2514 = vmatmul.mubr.msk.bf16.gmra.mxu0 %vm274_vm1, %v961_v13  ;;  %v966_v61 = vpack.c.bf16 %v880_v51, %v3035_v50  ;;  %v3064_v13 = vld [vmem:[#allocation2 + $0xd1] sm:$0xff] }
  0x39   : > { %2517 = vmatprep.mubr.msk.bf16.mxu0 %vm274_vm1, %v962_v14  ;;  %v564_v14 = vand.u32 15, %v342_v5  ;;  %v891_v51 = vld [vmem:[#allocation2 + $0x30] sm:$0xff]  ;;  %v896_v5 = vld [vmem:[#allocation2 + $0x58] sm:$0xff] }
  0x3a   : > { %2556 = vmatmul.mubr.msk.bf16.gmra.mxu1 %vm274_vm1, %v2862_v10  ;;  %v340_v10 = vadd.s32 232, %v2723_v6  ;;  %v882_v6 = vsel %vm3044_vm15, %v3048_v39, 0.0  ;;  %v1479_v2 = vpack.c.bf16 %v892_v52, %v891_v51  ;;  %v910_v39 = vld [vmem:[#allocation2 + $0xc8] sm:$0xff] }
  0x3b   : > { %2559 = vmatprep.mubr.msk.bf16.mxu1 %vm274_vm1, %v2874_v15  ;;  %v878_v15 = vsel %vm3012_vm13, %v3016_v38, 0.0  ;;  %v967_v19 = vpack.c.bf16 %v882_v6, %v3064_v13  ;;  %vm3082_vm2 = vcmp.lt.s32.totalorder %v564_v14, 15  ;;  %v1747_v14 = vpack.c.bf16 %v938_v36, %v2998_v23  ;;  %v906_v38 = vld [vmem:[#allocation2 + $0xa8] sm:$0xff] }
  0x3c   : > { %v550_v53 = vand.u32 15, %v340_v10  ;;  %v965_v54 = vpack.c.bf16 %v878_v15, %v3030_v48  ;;  %v886_v59 = vsel %vm3082_vm2, %v3086_v26, 0.0  ;;  %v890_v10 = vld [vmem:[#allocation2 + $0x28] sm:$0xff]  ;;  %v1748_v23 = vpack.c.bf16 %v940_v62, %v3003_v25  ;;  %v905_v25 = vld [vmem:[#allocation2 + $0xa0] sm:$0xff] }
  0x3d   : > { %v969_v41 = vpack.c.bf16 %v886_v59, %v3095_v43  ;;  %v907_v59 = vld [vmem:[#allocation2 + $0xb0] sm:$0xff] }
  0x3e   : > { %vm3056_vm0 = vcmp.lt.s32.totalorder %v550_v53, 15  ;;  %v1743_v53 = vpack.c.bf16 %v930_v3, %v2927_v44  ;;  %v1744_v44 = vpack.c.bf16 %v932_v7, %v2935_v49  ;;  %v897_v49 = vld [vmem:[#allocation2 + $0x60] sm:$0xff]  ;;  %v920_v3 = vld [vmem:[#allocation2 + $0x109] sm:$0xff] }
  0x3f   : > { %v950_v47 = vsel %vm3056_vm0, %v3086_v26, 0.0  ;;  %v914_v26 = vld [vmem:[#allocation2 + $0xe8] sm:$0xff] }
  0x40   : > { %2518 = vmatmul.mubr.msk.bf16.gmra.mxu0 %vm274_vm1, %v963_v32  ;;  %v888_v32 = vld [vmem:[#allocation2 + $0x18] sm:$0xff] }
  0x41   : > { %2521 = vmatprep.mubr.msk.bf16.mxu0 %vm274_vm1, %v964_v37  ;;  %v1741_v37 = vpack.c.bf16 %v926_v31, %v2867_v12  ;;  %v1477_v46 = vpack.c.bf16 %v888_v32, %v887_v24  ;;  %v889_v12 = vld [vmem:[#allocation2 + $0x20] sm:$0xff]  ;;  %v1749_v31 = vpack.c.bf16 %v942_v0, %v3030_v48  ;;  %v1750_v48 = vpack.c.bf16 %v944_v20, %v3035_v50  ;;  %v908_v24 = vld [vmem:[#allocation2 + $0xb8] sm:$0xff] }
  0x42   : > { %2560 = vmatmul.mubr.msk.bf16.gmra.mxu1 %vm274_vm1, %v2886_v22  ;;  %v3060_v22 = vld [vmem:[#allocation2 + $0xe9] sm:$0xff]  ;;  %v1751_v32 = vpack.c.bf16 %v946_v21, %v3064_v13  ;;  %v1487_v27 = vpack.c.bf16 %v908_v24, %v907_v59  ;;  %v909_v50 = vld [vmem:[#allocation2 + $0xc0] sm:$0xff] }
  0x43   : > { %2563 = vmatprep.mubr.msk.bf16.mxu1 %vm274_vm1, %v2896_v28  ;;  %v1739_v28 = vpack.c.bf16 %v922_v9, %v2815_v55  ;;  %v884_v56 = vsel %vm3056_vm0, %v3060_v22, 0.0  ;;  %v948_v45 = vsel %vm3044_vm15, %v3060_v22, 0.0  ;;  %v952_v22 = vsel %vm3082_vm2, %v920_v3, 0.0  ;;  %v918_v55 = vld [vmem:[#allocation2 + $0x108] sm:$0xff] }
  0x44   : > { %v968_v42 = vpack.c.bf16 %v884_v56, %v3070_v40  ;;  %v900_v56 = vld [vmem:[#allocation2 + $0x78] sm:$0xff]  ;;  %v1752_v13 = vpack.c.bf16 %v948_v45, %v3070_v40  ;;  %v913_v40 = vld [vmem:[#allocation2 + $0xe0] sm:$0xff] }
  0x45   : > { %v1490_v51 = vpack.c.bf16 %v914_v26, %v913_v40 }
  0x48   : > { %2522 = vmatmul.mubr.msk.bf16.gmra.mxu0 %vm274_vm1, %v965_v54  ;;  %v1478_v54 = vpack.c.bf16 %v890_v10, %v889_v12  ;;  %v1488_v12 = vpack.c.bf16 %v910_v39, %v909_v50  ;;  %v1754_v10 = vpack.c.bf16 %v952_v22, %v919_v11 }
  0x49   : > { %2525 = vmatprep.mubr.msk.bf16.mxu0 %vm274_vm1, %v966_v61  ;;  %v895_v61 = vld [vmem:[#allocation2 + $0x50] sm:$0xff] }
  0x4a   : > { %2564 = vmatmul.mubr.msk.bf16.gmra.mxu1 %vm274_vm1, %v2911_v33  ;;  %v1740_v33 = vpack.c.bf16 %v924_v63, %v2821_v58  ;;  %v928_v58 = vsel %vm2843_vm5, %v2858_v8, 0.0  ;;  %v934_v8 = vsel %vm2913_vm8, %v2952_v60, 0.0  ;;  %v1481_v29 = vpack.c.bf16 %v896_v5, %v895_v61  ;;  %v898_v60 = vld [vmem:[#allocation2 + $0x68] sm:$0xff]  ;;  %v904_v63 = vld [vmem:[#allocation2 + $0x98] sm:$0xff] }
  0x4b   : > { %2603 = vmatprep.mubr.msk.bf16.mxu1 %vm274_vm1, %v1739_v28  ;;  %v1742_v15 = vpack.c.bf16 %v928_v58, %v2876_v16  ;;  %v893_v16 = vld [vmem:[#allocation2 + $0x40] sm:$0xff]  ;;  %v1745_v9 = vpack.c.bf16 %v934_v8, %v2966_v1  ;;  %v1746_v1 = vpack.c.bf16 %v936_v34, %v2971_v4  ;;  %v899_v28 = vld [vmem:[#allocation2 + $0x70] sm:$0xff]  ;;  %v1753_v58 = vpack.c.bf16 %v950_v47, %v3095_v43  ;;  %v916_v43 = vld [vmem:[#allocation2 + $0xf8] sm:$0xff] }
  0x4c   : > { %v1480_v6 = vpack.c.bf16 %v894_v30, %v893_v16  ;;  %v1483_v57 = vpack.c.bf16 %v900_v56, %v899_v28  ;;  %v901_v4 = vld [vmem:[#allocation2 + $0x80] sm:$0xff] }
  0x50   : > { %2526 = vmatmul.mubr.msk.bf16.gmra.mxu0 %vm274_vm1, %v967_v19  ;;  %v1482_v19 = vpack.c.bf16 %v898_v60, %v897_v49 }
  0x51   : > { %2529 = vmatprep.mubr.msk.bf16.mxu0 %vm274_vm1, %v968_v42  ;;  %v903_v42 = vld [vmem:[#allocation2 + $0x90] sm:$0xff] }
  0x52   : > { %2604 = vmatmul.mubr.msk.bf16.vlgmr.msra.gmra.mxu1 %vm274_vm1, %v1740_v33  ;;  %v1484_v33 = vpack.c.bf16 %v902_v18, %v901_v4  ;;  %v1485_v17 = vpack.c.bf16 %v904_v63, %v903_v42 }
  0x53   : > { %2607 = vmatprep.mubr.msk.bf16.mxu1 %vm274_vm1, %v1741_v37  ;;  %v1486_v37 = vpack.c.bf16 %v906_v38, %v905_v25 }
  0x58   : > { %2530 = vmatmul.mubr.msk.bf16.gmra.mxu0 %vm274_vm1, %v969_v41  ;;  %v911_v41 = vld [vmem:[#allocation2 + $0xd0] sm:$0xff] }
  0x59   : > { %2569 = vmatprep.mubr.msk.bf16.mxu0 %vm274_vm1, %v1477_v46  ;;  %v912_v46 = vld [vmem:[#allocation2 + $0xd8] sm:$0xff] }
  0x5a   : > { %2608 = vmatmul.mubr.msk.bf16.gmra.mxu1 %vm274_vm1, %v1742_v15  ;;  %v1489_v35 = vpack.c.bf16 %v912_v46, %v911_v41  ;;  %v915_v15 = vld [vmem:[#allocation2 + $0xf0] sm:$0xff] }
  0x5b   : > { %2611 = vmatprep.mubr.msk.bf16.mxu1 %vm274_vm1, %v1743_v53  ;;  %v1491_v52 = vpack.c.bf16 %v916_v43, %v915_v15  ;;  %v917_v53 = vld [vmem:[#allocation2 + $0x100] sm:$0xff] }
  0x60   : > { %2570 = vmatmul.mubr.msk.bf16.vlgmr.msra.gmra.mxu0 %vm274_vm1, %v1478_v54  ;;  %v1492_v54 = vpack.c.bf16 %v918_v55, %v917_v53 }
  0x61   : > { %2573 = vmatprep.mubr.msk.bf16.mxu0 %vm274_vm1, %v1479_v2 }
  0x62   : > { %2612 = vmatmul.mubr.msk.bf16.gmra.mxu1 %vm274_vm1, %v1744_v44 }
  0x63   : > { %2615 = vmatprep.mubr.msk.bf16.mxu1 %vm274_vm1, %v1745_v9 }
  0x68   : > { %2574 = vmatmul.mubr.msk.bf16.gmra.mxu0 %vm274_vm1, %v1480_v6 }
  0x69   : > { %2577 = vmatprep.mubr.msk.bf16.mxu0 %vm274_vm1, %v1481_v29 }
  0x6a   : > { %2616 = vmatmul.mubr.msk.bf16.gmra.mxu1 %vm274_vm1, %v1746_v1 }
  0x6b   : > { %2619 = vmatprep.mubr.msk.bf16.mxu1 %vm274_vm1, %v1747_v14 }
  0x70   : > { %2578 = vmatmul.mubr.msk.bf16.gmra.mxu0 %vm274_vm1, %v1482_v19 }
  0x71   : > { %2581 = vmatprep.mubr.msk.bf16.mxu0 %vm274_vm1, %v1483_v57 }
  0x72   : > { %2620 = vmatmul.mubr.msk.bf16.gmra.mxu1 %vm274_vm1, %v1748_v23 }
  0x73   : > { %2623 = vmatprep.mubr.msk.bf16.mxu1 %vm274_vm1, %v1749_v31 }
  0x78   : > { %2582 = vmatmul.mubr.msk.bf16.gmra.mxu0 %vm274_vm1, %v1484_v33 }
  0x79   : > { %2585 = vmatprep.mubr.msk.bf16.mxu0 %vm274_vm1, %v1485_v17 }
  0x7a   : > { %2624 = vmatmul.mubr.msk.bf16.gmra.mxu1 %vm274_vm1, %v1750_v48 }
  0x7b   : > { %2627 = vmatprep.mubr.msk.bf16.mxu1 %vm274_vm1, %v1751_v32 }
  0x80   : > { %2586 = vmatmul.mubr.msk.bf16.gmra.mxu0 %vm274_vm1, %v1486_v37 }
  0x81   : > { %2589 = vmatprep.mubr.msk.bf16.mxu0 %vm274_vm1, %v1487_v27 }
  0x82   : > { %2628 = vmatmul.mubr.msk.bf16.gmra.mxu1 %vm274_vm1, %v1752_v13 }
  0x83   : > { %2631 = vmatprep.mubr.msk.bf16.mxu1 %vm274_vm1, %v1753_v58 }
  0x88   : > { %2590 = vmatmul.mubr.msk.bf16.gmra.mxu0 %vm274_vm1, %v1488_v12 }
  0x89   : > { %2593 = vmatprep.mubr.msk.bf16.mxu0 %vm274_vm1, %v1489_v35 }
  0x8a   : > { %2632 = vmatmul.mubr.msk.bf16.gmra.mxu1 %vm274_vm1, %v1754_v10 }
  0x90   : > { %2594 = vmatmul.mubr.msk.bf16.gmra.mxu0 %vm274_vm1, %v1490_v51 }
  0x91   : > { %2597 = vmatprep.mubr.msk.bf16.mxu0 %vm274_vm1, %v1491_v52 }
  0x98   : > { %2598 = vmatmul.mubr.msk.bf16.gmra.mxu0 %vm274_vm1, %v1492_v54  ;;  %vm2040_vm1 = vcmask 261120  }
  0xd2   : > { %v3184_v2 = vpop.f32.mrf.mxu1 }
  0xd4   : > { %v3186_v7 = vpop.f32.mrf.mxu1 }
  0xd6   : > { %v3188_v8 = vpop.f32.mrf.mxu1 }
  0xd8   : > { %v3190_v16 = vpop.f32.mrf.mxu1 }
  0xda   : > { %v3192_v30 = vpop.f32.mrf.mxu1 }
  0xdc   : > { %v3194_v44 = vpop.f32.mrf.mxu1 }
  0xde   : > { %v3198_v5 = vpop.f32.mrf.mxu1 }
  0xe0   : > { %v3196_v61 = vpop.f32.mrf.mxu0  ;;  %v3202_v6 = vpop.f32.mrf.mxu1 }
  0xe2   : > { %v3200_v9 = vpop.f32.mrf.mxu0  ;;  %v3206_v34 = vpop.f32.mrf.mxu1 }
  0xe4   : > { %v3204_v29 = vpop.f32.mrf.mxu0  ;;  %v3210_v49 = vpop.f32.mrf.mxu1 }
  0xe6   : > { %v3208_v36 = vpop.f32.mrf.mxu0  ;;  %v3214_v1 = vpop.f32.mrf.mxu1 }
  0xe8   : > { %v3212_v60 = vpop.f32.mrf.mxu0  ;;  %v3218_v56 = vpop.f32.mrf.mxu1 }
  0xea   : > { %v3216_v28 = vpop.f32.mrf.mxu0  ;;  %v3222_v19 = vpop.f32.mrf.mxu1 }
  0xec   : > { %v3220_v14 = vpop.f32.mrf.mxu0  ;;  %v3226_v62 = vpop.f32.mrf.mxu1 }
  0xee   : > { %v3224_v57 = vpop.f32.mrf.mxu0  ;;  %v3230_v4 = vpop.f32.mrf.mxu1 }
  0xf0   : > { %v3228_v0 = vpop.f32.mrf.mxu0  ;;  %v3234_v23 = vpop.f32.mrf.mxu1 }
  0xf2   : > { %v3232_v18 = vpop.f32.mrf.mxu0  ;;  %v3238_v63 = vpop.f32.mrf.mxu1 }
  0xf4   : > { %v3236_v42 = vpop.f32.mrf.mxu0  ;;  %v3242_v33 = vpop.f32.mrf.mxu1 }
  0xf6   : > { %v3240_v31 = vpop.f32.mrf.mxu0  ;;  %v3246_v20 = vpop.f32.mrf.mxu1 }
  0xf8   : > { %v3244_v17 = vpop.f32.mrf.mxu0  ;;  %v3250_v25 = vpop.f32.mrf.mxu1 }
  0xfa   : > { %v3248_v21 = vpop.f32.mrf.mxu0  ;;  %v3254_v48 = vpop.f32.mrf.mxu1 }
  0xfc   : > { %v3252_v38 = vpop.f32.mrf.mxu0  ;;  %v3258_v24 = vpop.f32.mrf.mxu1 }
  0xfe   : > { %v3256_v59 = vpop.f32.mrf.mxu0  ;;  %v3262_v37 = vpop.f32.mrf.mxu1 }
 0x100   : > { %v3260_v32 = vpop.f32.mrf.mxu0  ;;  %v3266_v45 = vpop.f32.mrf.mxu1 }
 0x102   : > { %v3264_v27 = vpop.f32.mrf.mxu0  ;;  %v3270_v50 = vpop.f32.mrf.mxu1 }
 0x104   : > { %v3268_v47 = vpop.f32.mrf.mxu0  ;;  %v3274_v13 = vpop.f32.mrf.mxu1 }
 0x105   : > { %3726 = vst [vmem:[#allocation3_spill] sm:$0xff] %v3274_v13 }
 0x106   : > { %v3272_v39 = vpop.f32.mrf.mxu0  ;;  %v3278_v46 = vpop.f32.mrf.mxu1 }
 0x107   : > { %3727 = vst [vmem:[#allocation4_spill] sm:$0xff] %v3278_v46 }
 0x108   : > { %v3276_v41 = vpop.f32.mrf.mxu0  ;;  %v3282_v3 = vpop.f32.mrf.mxu1 }
 0x109   : > { %3728 = vst [vmem:[#allocation5_spill] sm:$0xff] %v3282_v3 }
 0x10a   : > { %v3280_v58 = vpop.f32.mrf.mxu0  ;;  %v3286_v35 = vpop.f32.mrf.mxu1 }
 0x10b   : > { %3729 = vst [vmem:[#allocation6_spill] sm:$0xff] %v3286_v35 }
 0x10c   : > { %v3284_v12 = vpop.f32.mrf.mxu0  ;;  %v3290_v22 = vpop.f32.mrf.mxu1 }
 0x10d   : > { %3730 = vst [vmem:[#allocation7_spill] sm:$0xff] %v3290_v22 }
 0x10e   : > { %v3288_v11 = vpop.f32.mrf.mxu0  ;;  %v3294_v26 = vpop.f32.mrf.mxu1 }
 0x10f   : > { %3731 = vst [vmem:[#allocation8_spill] sm:$0xff] %v3294_v26 }
 0x110   : > { %v3292_v40 = vpop.f32.mrf.mxu0  ;;  %v3298_v15 = vpop.f32.mrf.mxu1 }
 0x111   : > { %3732 = vst [vmem:[#allocation9_spill] sm:$0xff] %v3298_v15  ;;  %v1359_v15 = vadd.f32 %v3184_v2, %v3196_v61  ;;  %v1375_v2 = vadd.f32 %v3192_v30, %v3212_v60  ;;  %v1367_v61 = vadd.f32 %v3194_v44, %v3216_v28  ;;  %v3346_v30 = vadd.f32 %v3206_v34, %v3228_v0 }
 0x112   : > { %v3296_v10 = vpop.f32.mrf.mxu0  ;;  %v2605_v51 = vpop.f32.mrf.mxu1  ;;  %v3350_v44 = vadd.f32 %v3210_v49, %v3232_v18  ;;  %v3354_v60 = vadd.f32 %v3214_v1, %v3236_v42  ;;  %v3367_v34 = vadd.f32 %v3222_v19, %v3244_v17  ;;  %v3382_v0 = vadd.f32 %v3234_v23, %v3256_v59 }
 0x113   : > { %v3386_v19 = vadd.f32 %v3238_v63, %v3260_v32  ;;  %v3390_v42 = vadd.f32 %v3242_v33, %v3264_v27  ;;  %v3403_v63 = vadd.f32 %v3250_v25, %v3272_v39  ;;  %v3407_v17 = vadd.f32 %v3254_v48, %v3276_v41  ;;  %v3739_v32 = vld [vmem:[#allocation3_spill] sm:$0xff] }
 0x114   : > { %v3300_v43 = vpop.f32.mrf.mxu0  ;;  %v1842_v53 = vpop.f32.mrf.mxu1  ;;  %v3411_v33 = vadd.f32 %v3258_v24, %v3280_v58  ;;  %v3419_v59 = vadd.f32 %v3266_v45, %v3288_v11  ;;  %v3423_v25 = vadd.f32 %v3270_v50, %v3292_v40  ;;  %v3432_v27 = vadd.f32 %v3739_v32, %v3296_v10  ;;  %v3743_v50 = vld [vmem:[#allocation5_spill] sm:$0xff]  ;;  %v3745_v11 = vld [vmem:[#allocation6_spill] sm:$0xff] }
 0x115   : > { %3733 = vst [vmem:[#allocation10_spill] sm:$0xff] %v3300_v43 }
 0x116   : > { %v3302_v52 = vpop.f32.mrf.mxu0  ;;  %v2606_v54 = vpop.f32.mrf.mxu1 }
 0x117   : > { %3734 = vst [vmem:[#allocation11_spill] sm:$0xff] %v3302_v52  ;;  %v1351_v52 = vadd.f32 %v3186_v7, %v3200_v9  ;;  %v3334_v7 = vld [vmem:[%s3691_s2] ss:$0 sm:$0xff] }
 0x118   : > { %v3304_v55 = vpop.f32.mrf.mxu0  ;;  %v1845_v22 = vpop.f32.mrf.mxu1 }
 0x119   : > { %3735 = vst [vmem:[#allocation12_spill] sm:$0xff] %v3304_v55 }
 0x11a   : > { %v3306_v35 = vpop.f32.mrf.mxu0  ;;  %v3310_v26 = vpop.f32.mrf.mxu1 }
 0x11b   : > { %3736 = vst [vmem:[#allocation13_spill] sm:$0xff] %v3306_v35 }
 0x11c   : > { %v3308_v3 = vpop.f32.mrf.mxu0  ;;  %v3316_v43 = vpop.f32.mrf.mxu1 }
 0x11d   : > { %3737 = vst [vmem:[#allocation14_spill] sm:$0xff] %v3308_v3  ;;  %v1362_v3 = vadd.f32 %v3188_v8, %v3204_v29  ;;  %v3340_v8 = vadd.f32 %v3202_v6, %v3224_v57  ;;  %v3378_v57 = vadd.f32 %v3230_v4, %v3252_v38  ;;  %v3415_v38 = vadd.f32 %v3262_v37, %v3284_v12  ;;  %v3740_v37 = vld [vmem:[#allocation10_spill] sm:$0xff] }
 0x11e   : > { %v3312_v46 = vpop.f32.mrf.mxu0  ;;  %v3321_v35 = vpop.f32.mrf.mxu1  ;;  %v3742_v58 = vld [vmem:[#allocation11_spill] sm:$0xff] }
 0x11f   : > { %3738 = vst [vmem:[#allocation15_spill] sm:$0xff] %v3312_v46  ;;  %v1354_v46 = vadd.f32 %v3190_v16, %v3208_v36 }
 0x120   : > { %v2571_v13 = vpop.f32.mrf.mxu0  ;;  %v3342_v36 = vpop.f32.mrf.mxu1  ;;  %v3744_v12 = vld [vmem:[#allocation12_spill] sm:$0xff] }
 0x121   : > { %v1709_v55 = vadd.f32 %v2571_v13, %v1359_v15  ;;  %v1378_v13 = vadd.f32 %v3198_v5, %v3220_v14  ;;  %v3358_v5 = vadd.f32 %v3218_v56, %v3240_v31  ;;  %v3374_v56 = vadd.f32 %v3226_v62, %v3248_v21 }
 0x122   : > { %v1580_v9 = vpop.f32.mrf.mxu0  ;;  %v3370_v14 = vpop.f32.mrf.mxu1  ;;  %v3394_v62 = vadd.f32 %v3246_v20, %v3268_v47  ;;  %v3741_v47 = vld [vmem:[#allocation4_spill] sm:$0xff]  ;;  %v3444_v40 = vadd.f32 %v3745_v11, %v3744_v12  ;;  %v3746_v15 = vld [vmem:[#allocation13_spill] sm:$0xff] }
 0x123   : > { %v1971_v16 = vadd.f32 %v2605_v51, %v1709_v55  ;;  %v1707_v29 = vadd.f32 %v1580_v9, %v1351_v52  ;;  %v3436_v39 = vadd.f32 %v3741_v47, %v3740_v37  ;;  %v3747_v51 = vld [vmem:[#allocation7_spill] sm:$0xff] }
 0x124   : > { %v2572_v6 = vpop.f32.mrf.mxu0  ;;  %v3399_v31 = vpop.f32.mrf.mxu1  ;;  %v3448_v10 = vadd.f32 %v3747_v51, %v3746_v15 }
 0x125   : > { %v2010_v49 = vadd.f32 %v3334_v7, %v1971_v16  ;;  %v1969_v28 = vadd.f32 %v1842_v53, %v1707_v29  ;;  %v1710_v1 = vadd.f32 %v2572_v6, %v1362_v3  ;;  %v3440_v3 = vadd.f32 %v3743_v50, %v3742_v58  ;;  %v3748_v16 = vld [vmem:[#allocation14_spill] sm:$0xff]  ;;  %v3749_v29 = vld [vmem:[#allocation8_spill] sm:$0xff] }
 0x126   : > { %v1583_v18 = vpop.f32.mrf.mxu0  ;;  %v3428_v24 = vpop.f32.mrf.mxu1  ;;  %v3458_v6 = vadd.f32 %v3749_v29, %v3748_v16 }
 0x127   : > { %2043 = vst.msk [vmem:[%s3363_s8 + $0x10] sm:$0xff] %vm2040_vm1, %v2010_v49  ;;  %v2008_v4 = vadd.f32 %v3334_v7, %v1969_v28  ;;  %v1972_v23 = vadd.f32 %v2606_v54, %v1710_v1  ;;  %v1708_v20 = vadd.f32 %v1583_v18, %v1354_v46 }
 0x128   : > { %v2575_v21 = vpop.f32.mrf.mxu0  ;;  %v3452_v53 = vpop.f32.mrf.mxu1 }
 0x129   : > { %2041 = vst.msk [vmem:[%s3363_s8] sm:$0xff] %vm2040_vm1, %v2008_v4  ;;  %v2011_v48 = vadd.f32 %v3334_v7, %v1972_v23  ;;  %v1970_v45 = vadd.f32 %v1845_v22, %v1708_v20  ;;  %v1713_v41 = vadd.f32 %v2575_v21, %v1375_v2  ;;  %v2144_v22 = vmul.f32 %v2010_v49, %v2010_v49 }
 0x12a   : > { %v1596_v46 = vpop.f32.mrf.mxu0  ;;  %v2142_v55 = vmul.f32 %v2008_v4, %v2008_v4  ;;  %v2073_v28 = vsel %vm2040_vm1, %v2008_v4, 0.0  ;;  %v3462_v23 = vpop.f32.mrf.mxu1 }
 0x12b   : > { %2044 = vst.msk [vmem:[%s3363_s8 + $0x18] sm:$0xff] %vm2040_vm1, %v2011_v48  ;;  %v1711_v52 = vadd.f32 %v1596_v46, %v1367_v61  ;;  %v2009_v54 = vadd.f32 %v3334_v7, %v1970_v45  ;;  %v1975_v2 = vadd.f32 %v3310_v26, %v1713_v41  ;;  %v2145_v61 = vmul.f32 %v2011_v48, %v2011_v48 }
 0x12c   : > { %v2576_v9 = vpop.f32.mrf.mxu0  ;;  %v2076_v45 = vsel %vm2040_vm1, %v2010_v49, 0.0  ;;  %v2177_v41 = vsel %vm2040_vm1, %v2144_v22, 0.0  ;;  %v2174_v46 = vsel %vm2040_vm1, %v2142_v55, 0.0  ;;  %v2078_v12 = vsel %vm2040_vm1, %v2011_v48, 0.0 }
 0x12d   : > { %v1973_v1 = vadd.f32 %v3316_v43, %v1711_v52  ;;  %v1714_v18 = vadd.f32 %v2576_v9, %v1378_v13  ;;  %2042 = vst.msk [vmem:[%s3363_s8 + $0x8] sm:$0xff] %vm2040_vm1, %v2009_v54  ;;  %v2074_v20 = vsel %vm2040_vm1, %v2009_v54, 0.0  ;;  %v2143_v21 = vmul.f32 %v2009_v54, %v2009_v54  ;;  %v3471_v13 = vpop.f32.mrf.mxu1 }
 0x12e   : > { %v2014_v26 = vadd.f32 %v3334_v7, %v1975_v2  ;;  %v1599_v32 = vpop.f32.mrf.mxu0  ;;  %v2075_v37 = vadd.f32 %v2074_v20, %v2073_v28  ;;  %v2179_v49 = vsel %vm2040_vm1, %v2145_v61, 0.0 }
 0x12f   : > { %v2012_v47 = vadd.f32 %v3334_v7, %v1973_v1  ;;  %v1976_v4 = vadd.f32 %v3321_v35, %v1714_v18  ;;  %v1712_v43 = vadd.f32 %v1599_v32, %v3340_v8  ;;  %v2175_v58 = vsel %vm2040_vm1, %v2143_v21, 0.0  ;;  %v3482_v8 = vpop.f32.mrf.mxu1 }
 0x130   : > { %2047 = vst.msk [vmem:[%s3363_s8 + $0x30] sm:$0xff] %vm2040_vm1, %v2014_v26  ;;  %v2579_v50 = vpop.f32.mrf.mxu0  ;;  %v2077_v11 = vadd.f32 %v2076_v45, %v2075_v37  ;;  %v2176_v15 = vadd.f32 %v2175_v58, %v2174_v46  ;;  %v2148_v2 = vmul.f32 %v2014_v26, %v2014_v26  ;;  %v2084_v46 = vsel %vm2040_vm1, %v2014_v26, 0.0 }
 0x131   : > { %2045 = vst.msk [vmem:[%s3363_s8 + $0x20] sm:$0xff] %vm2040_vm1, %v2012_v47  ;;  %v2146_v35 = vmul.f32 %v2012_v47, %v2012_v47  ;;  %v2015_v51 = vadd.f32 %v3334_v7, %v1976_v4  ;;  %v1974_v52 = vadd.f32 %v3342_v36, %v1712_v43  ;;  %v1717_v22 = vadd.f32 %v2579_v50, %v3346_v30  ;;  %v3489_v16 = vpop.f32.mrf.mxu1 }
 0x132   : > { %v1612_v55 = vpop.f32.mrf.mxu0  ;;  %v2178_v54 = vadd.f32 %v2177_v41, %v2176_v15  ;;  %v2079_v48 = vadd.f32 %v2078_v12, %v2077_v11  ;;  %v2080_v29 = vsel %vm2040_vm1, %v2012_v47, 0.0  ;;  %v2185_v58 = vsel %vm2040_vm1, %v2148_v2, 0.0 }
 0x133   : > { %v1715_v9 = vadd.f32 %v1612_v55, %v3350_v44  ;;  %v2181_v28 = vsel %vm2040_vm1, %v2146_v35, 0.0  ;;  %2048 = vst.msk [vmem:[%s3363_s8 + $0x38] sm:$0xff] %vm2040_vm1, %v2015_v51  ;;  %v2013_v1 = vadd.f32 %v3334_v7, %v1974_v52  ;;  %v1979_v36 = vadd.f32 %v3370_v14, %v1717_v22  ;;  %v3499_v44 = vpop.f32.mrf.mxu1 }
 0x134   : > { %v2580_v30 = vpop.f32.mrf.mxu0  ;;  %v2081_v18 = vadd.f32 %v2080_v29, %v2079_v48  ;;  %v2180_v61 = vadd.f32 %v2179_v49, %v2178_v54  ;;  %v2149_v32 = vmul.f32 %v2015_v51, %v2015_v51  ;;  %v2086_v15 = vsel %vm2040_vm1, %v2015_v51, 0.0 }
 0x135   : > { %v1977_v20 = vadd.f32 %v3399_v31, %v1715_v9  ;;  %v1718_v21 = vadd.f32 %v2580_v30, %v3354_v60  ;;  %2046 = vst.msk [vmem:[%s3363_s8 + $0x28] sm:$0xff] %vm2040_vm1, %v2013_v1  ;;  %v2082_v37 = vsel %vm2040_vm1, %v2013_v1, 0.0  ;;  %v2147_v47 = vmul.f32 %v2013_v1, %v2013_v1  ;;  %v3507_v60 = vpop.f32.mrf.mxu1 }
 0x136   : > { %v2018_v4 = vadd.f32 %v3334_v7, %v1979_v36  ;;  %v1615_v14 = vpop.f32.mrf.mxu0  ;;  %v2182_v43 = vadd.f32 %v2181_v28, %v2180_v61  ;;  %v2083_v45 = vadd.f32 %v2082_v37, %v2081_v18  ;;  %v2187_v26 = vsel %vm2040_vm1, %v2149_v32, 0.0 }
 0x137   : > { %v2016_v41 = vadd.f32 %v3334_v7, %v1977_v20  ;;  %v1980_v31 = vadd.f32 %v3428_v24, %v1718_v21  ;;  %v2183_v50 = vsel %vm2040_vm1, %v2147_v47, 0.0  ;;  %v1716_v12 = vadd.f32 %v1615_v14, %v3358_v5  ;;  %v3518_v52 = vpop.f32.mrf.mxu1 }
 0x138   : > { %2051 = vst.msk [vmem:[%s3363_s8 + $0x50] sm:$0xff] %vm2040_vm1, %v2018_v4  ;;  %v2583_v11 = vpop.f32.mrf.mxu0  ;;  %v2085_v35 = vadd.f32 %v2084_v46, %v2083_v45  ;;  %v2184_v49 = vadd.f32 %v2183_v50, %v2182_v43  ;;  %v2152_v48 = vmul.f32 %v2018_v4, %v2018_v4 }
 0x139   : > { %2049 = vst.msk [vmem:[%s3363_s8 + $0x40] sm:$0xff] %vm2040_vm1, %v2016_v41  ;;  %v2150_v24 = vmul.f32 %v2016_v41, %v2016_v41  ;;  %v2019_v22 = vadd.f32 %v3334_v7, %v1980_v31  ;;  %v1978_v55 = vadd.f32 %v3452_v53, %v1716_v12  ;;  %v1721_v54 = vadd.f32 %v2583_v11, %v3367_v34  ;;  %v3525_v29 = vpop.f32.mrf.mxu1 }
 0x13a   : > { %v1628_v5 = vpop.f32.mrf.mxu0  ;;  %v2186_v2 = vadd.f32 %v2185_v58, %v2184_v49  ;;  %v2087_v51 = vadd.f32 %v2086_v15, %v2085_v35  ;;  %v2088_v28 = vsel %vm2040_vm1, %v2016_v41, 0.0  ;;  %v2092_v41 = vsel %vm2040_vm1, %v2018_v4, 0.0 }
 0x13b   : > { %v1719_v9 = vadd.f32 %v1628_v5, %v3374_v56  ;;  %v2189_v1 = vsel %vm2040_vm1, %v2150_v24, 0.0  ;;  %2052 = vst.msk [vmem:[%s3363_s8 + $0x58] sm:$0xff] %vm2040_vm1, %v2019_v22  ;;  %v2017_v36 = vadd.f32 %v3334_v7, %v1978_v55  ;;  %v1983_v53 = vadd.f32 %v3462_v23, %v1721_v54  ;;  %v3535_v56 = vpop.f32.mrf.mxu1 }
 0x13c   : > { %v2584_v34 = vpop.f32.mrf.mxu0  ;;  %v2089_v30 = vadd.f32 %v2088_v28, %v2087_v51  ;;  %v2188_v18 = vadd.f32 %v2187_v26, %v2186_v2  ;;  %v2153_v21 = vmul.f32 %v2019_v22, %v2019_v22  ;;  %v2193_v31 = vsel %vm2040_vm1, %v2152_v48, 0.0 }
 0x13d   : > { %v1981_v61 = vadd.f32 %v3471_v13, %v1719_v9  ;;  %v1722_v20 = vadd.f32 %v2584_v34, %v3378_v57  ;;  %2050 = vst.msk [vmem:[%s3363_s8 + $0x48] sm:$0xff] %vm2040_vm1, %v2017_v36  ;;  %v2090_v32 = vsel %vm2040_vm1, %v2017_v36, 0.0  ;;  %v2151_v37 = vmul.f32 %v2017_v36, %v2017_v36  ;;  %v3543_v57 = vpop.f32.mrf.mxu1 }
 0x13e   : > { %v2022_v47 = vadd.f32 %v3334_v7, %v1983_v53  ;;  %v1631_v23 = vpop.f32.mrf.mxu0  ;;  %v2190_v14 = vadd.f32 %v2189_v1, %v2188_v18  ;;  %v2091_v43 = vadd.f32 %v2090_v32, %v2089_v30  ;;  %v2094_v12 = vsel %vm2040_vm1, %v2019_v22, 0.0 }
 0x13f   : > { %v2020_v45 = vadd.f32 %v3334_v7, %v1981_v61  ;;  %v1984_v13 = vadd.f32 %v3482_v8, %v1722_v20  ;;  %v2191_v46 = vsel %vm2040_vm1, %v2151_v37, 0.0  ;;  %v1720_v58 = vadd.f32 %v1631_v23, %v3382_v0  ;;  %v3554_v35 = vpop.f32.mrf.mxu1 }
 0x140   : > { %2055 = vst.msk [vmem:[%s3363_s8 + $0x70] sm:$0xff] %vm2040_vm1, %v2022_v47  ;;  %v2587_v50 = vpop.f32.mrf.mxu0  ;;  %v2093_v11 = vadd.f32 %v2092_v41, %v2091_v43  ;;  %v2192_v15 = vadd.f32 %v2191_v46, %v2190_v14  ;;  %v2195_v4 = vsel %vm2040_vm1, %v2153_v21, 0.0  ;;  %v2156_v54 = vmul.f32 %v2022_v47, %v2022_v47 }
 0x141   : > { %2053 = vst.msk [vmem:[%s3363_s8 + $0x60] sm:$0xff] %vm2040_vm1, %v2020_v45  ;;  %v2154_v8 = vmul.f32 %v2020_v45, %v2020_v45  ;;  %v2023_v49 = vadd.f32 %v3334_v7, %v1984_v13  ;;  %v1982_v24 = vadd.f32 %v3489_v16, %v1720_v58  ;;  %v1725_v26 = vadd.f32 %v2587_v50, %v3386_v19  ;;  %v3561_v2 = vpop.f32.mrf.mxu1 }
 0x142   : > { %v1644_v0 = vpop.f32.mrf.mxu0  ;;  %v2194_v55 = vadd.f32 %v2193_v31, %v2192_v15  ;;  %v2095_v22 = vadd.f32 %v2094_v12, %v2093_v11  ;;  %v2096_v48 = vsel %vm2040_vm1, %v2020_v45, 0.0  ;;  %v2201_v37 = vsel %vm2040_vm1, %v2156_v54, 0.0 }
 0x143   : > { %v1723_v5 = vadd.f32 %v1644_v0, %v3390_v42  ;;  %v2197_v51 = vsel %vm2040_vm1, %v2154_v8, 0.0  ;;  %2056 = vst.msk [vmem:[%s3363_s8 + $0x78] sm:$0xff] %vm2040_vm1, %v2023_v49  ;;  %v2021_v9 = vadd.f32 %v3334_v7, %v1982_v24  ;;  %v1987_v16 = vadd.f32 %v3499_v44, %v1725_v26  ;;  %v3571_v53 = vpop.f32.mrf.mxu1 }
 0x144   : > { %v2588_v19 = vpop.f32.mrf.mxu0  ;;  %v2097_v28 = vadd.f32 %v2096_v48, %v2095_v22  ;;  %v2196_v1 = vadd.f32 %v2195_v4, %v2194_v55  ;;  %v2157_v34 = vmul.f32 %v2023_v49, %v2023_v49  ;;  %v2102_v45 = vsel %vm2040_vm1, %v2023_v49, 0.0 }
 0x145   : > { %v1985_v36 = vadd.f32 %v3507_v60, %v1723_v5  ;;  %v1726_v42 = vadd.f32 %v2588_v19, %v3394_v62  ;;  %2054 = vst.msk [vmem:[%s3363_s8 + $0x68] sm:$0xff] %vm2040_vm1, %v2021_v9  ;;  %v2098_v30 = vsel %vm2040_vm1, %v2021_v9, 0.0  ;;  %v2155_v18 = vmul.f32 %v2021_v9, %v2021_v9 }
 0x146   : > { %v2026_v61 = vadd.f32 %v3334_v7, %v1987_v16  ;;  %v1647_v44 = vpop.f32.mrf.mxu0  ;;  %v2198_v20 = vadd.f32 %v2197_v51, %v2196_v1  ;;  %v2099_v21 = vadd.f32 %v2098_v30, %v2097_v28  ;;  %v2100_v62 = vsel %vm2040_vm1, %v2022_v47, 0.0 }
 0x147   : > { %v2024_v32 = vadd.f32 %v3334_v7, %v1985_v36  ;;  %v1988_v60 = vadd.f32 %v3518_v52, %v1726_v42  ;;  %v2199_v23 = vsel %vm2040_vm1, %v2155_v18, 0.0  ;;  %v1724_v14 = vadd.f32 %v1647_v44, %v3403_v63  ;;  %v1938_v52 = vpop.f32.mrf.mxu1 }
 0x148   : > { %2059 = vst.msk [vmem:[%s3363_s8 + $0x90] sm:$0xff] %vm2040_vm1, %v2026_v61  ;;  %v2591_v43 = vpop.f32.mrf.mxu0  ;;  %v2101_v13 = vadd.f32 %v2100_v62, %v2099_v21  ;;  %v2200_v41 = vadd.f32 %v2199_v23, %v2198_v20  ;;  %v2203_v47 = vsel %vm2040_vm1, %v2157_v34, 0.0  ;;  %v2160_v11 = vmul.f32 %v2026_v61, %v2026_v61 }
 0x149   : > { %2057 = vst.msk [vmem:[%s3363_s8 + $0x80] sm:$0xff] %vm2040_vm1, %v2024_v32  ;;  %v2158_v31 = vmul.f32 %v2024_v32, %v2024_v32  ;;  %v2027_v46 = vadd.f32 %v3334_v7, %v1988_v60  ;;  %v1986_v58 = vadd.f32 %v3525_v29, %v1724_v14  ;;  %v1729_v50 = vadd.f32 %v2591_v43, %v3407_v17  ;;  %v2630_v22 = vpop.f32.mrf.mxu1 }
 0x14a   : > { %v1660_v12 = vpop.f32.mrf.mxu0  ;;  %v2202_v63 = vadd.f32 %v2201_v37, %v2200_v41  ;;  %v2103_v15 = vadd.f32 %v2102_v45, %v2101_v13  ;;  %v2104_v4 = vsel %vm2040_vm1, %v2024_v32, 0.0  ;;  %v2108_v28 = vsel %vm2040_vm1, %v2026_v61, 0.0 }
 0x14b   : > { %v1727_v8 = vadd.f32 %v1660_v12, %v3411_v33  ;;  %v2205_v49 = vsel %vm2040_vm1, %v2158_v31, 0.0  ;;  %2060 = vst.msk [vmem:[%s3363_s8 + $0x98] sm:$0xff] %vm2040_vm1, %v2027_v46  ;;  %v2025_v24 = vadd.f32 %v3334_v7, %v1986_v58  ;;  %v1991_v26 = vadd.f32 %v3535_v56, %v1729_v50 }
 0x14c   : > { %v2592_v29 = vpop.f32.mrf.mxu0  ;;  %v2105_v0 = vadd.f32 %v2104_v4, %v2103_v15  ;;  %v2204_v17 = vadd.f32 %v2203_v47, %v2202_v63  ;;  %v2161_v33 = vmul.f32 %v2027_v46, %v2027_v46  ;;  %v2110_v34 = vsel %vm2040_vm1, %v2027_v46, 0.0  ;;  %v3751_v4 = vld [vmem:[#allocation9_spill] sm:$0xff] }
 0x14d   : > { %v1989_v55 = vadd.f32 %v3543_v57, %v1727_v8  ;;  %v1730_v54 = vadd.f32 %v2592_v29, %v3415_v38  ;;  %2058 = vst.msk [vmem:[%s3363_s8 + $0x88] sm:$0xff] %vm2040_vm1, %v2025_v24  ;;  %v2106_v5 = vsel %vm2040_vm1, %v2025_v24, 0.0  ;;  %v2159_v48 = vmul.f32 %v2025_v24, %v2025_v24 }
 0x14e   : > { %v2030_v51 = vadd.f32 %v3334_v7, %v1991_v26  ;;  %v1663_v9 = vpop.f32.mrf.mxu0  ;;  %v2206_v56 = vadd.f32 %v2205_v49, %v2204_v17  ;;  %v2107_v16 = vadd.f32 %v2106_v5, %v2105_v0  ;;  %v2209_v38 = vsel %vm2040_vm1, %v2160_v11, 0.0 }
 0x14f   : > { %v2028_v19 = vadd.f32 %v3334_v7, %v1989_v55  ;;  %v1992_v57 = vadd.f32 %v3554_v35, %v1730_v54  ;;  %v2207_v1 = vsel %vm2040_vm1, %v2159_v48, 0.0  ;;  %v1728_v36 = vadd.f32 %v1663_v9, %v3419_v59  ;;  %v1941_v35 = vpop.f32.mrf.mxu1 }
 0x150   : > { %2063 = vst.msk [vmem:[%s3363_s8 + $0xb0] sm:$0xff] %vm2040_vm1, %v2030_v51  ;;  %v2595_v42 = vpop.f32.mrf.mxu0  ;;  %v2109_v30 = vadd.f32 %v2108_v28, %v2107_v16  ;;  %v2208_v18 = vadd.f32 %v2207_v1, %v2206_v56  ;;  %v2211_v61 = vsel %vm2040_vm1, %v2161_v33, 0.0  ;;  %v2164_v62 = vmul.f32 %v2030_v51, %v2030_v51 }
 0x151   : > { %2061 = vst.msk [vmem:[%s3363_s8 + $0xa0] sm:$0xff] %vm2040_vm1, %v2028_v19  ;;  %v2162_v44 = vmul.f32 %v2028_v19, %v2028_v19  ;;  %v2031_v20 = vadd.f32 %v3334_v7, %v1992_v57  ;;  %v1990_v21 = vadd.f32 %v3561_v2, %v1728_v36  ;;  %v1733_v32 = vadd.f32 %v2595_v42, %v3423_v25  ;;  %v2633_v46 = vpop.f32.mrf.mxu1 }
 0x152   : > { %v1676_v60 = vpop.f32.mrf.mxu0  ;;  %v2210_v59 = vadd.f32 %v2209_v38, %v2208_v18  ;;  %v2111_v37 = vadd.f32 %v2110_v34, %v2109_v30  ;;  %v2112_v14 = vsel %vm2040_vm1, %v2028_v19, 0.0  ;;  %v2217_v0 = vsel %vm2040_vm1, %v2164_v62, 0.0 }
 0x153   : > { %v1731_v23 = vadd.f32 %v1676_v60, %v3432_v27  ;;  %v2213_v43 = vsel %vm2040_vm1, %v2162_v44, 0.0  ;;  %2064 = vst.msk [vmem:[%s3363_s8 + $0xb8] sm:$0xff] %vm2040_vm1, %v2031_v20  ;;  %v2029_v45 = vadd.f32 %v3334_v7, %v1990_v21  ;;  %v1995_v13 = vadd.f32 %v3571_v53, %v1733_v32 }
 0x154   : > { %v2596_v2 = vpop.f32.mrf.mxu0  ;;  %v2113_v41 = vadd.f32 %v2112_v14, %v2111_v37  ;;  %v2212_v25 = vadd.f32 %v2211_v61, %v2210_v59  ;;  %v2165_v58 = vmul.f32 %v2031_v20, %v2031_v20  ;;  %v2118_v17 = vsel %vm2040_vm1, %v2031_v20, 0.0 }
 0x155   : > { %v1993_v31 = vadd.f32 %v1938_v52, %v1731_v23  ;;  %v1734_v47 = vadd.f32 %v2596_v2, %v3436_v39  ;;  %2062 = vst.msk [vmem:[%s3363_s8 + $0xa8] sm:$0xff] %vm2040_vm1, %v2029_v45  ;;  %v2114_v27 = vsel %vm2040_vm1, %v2029_v45, 0.0  ;;  %v2163_v50 = vmul.f32 %v2029_v45, %v2029_v45  ;;  %v3750_v52 = vld [vmem:[#allocation15_spill] sm:$0xff] }
 0x156   : > { %v2034_v12 = vadd.f32 %v3334_v7, %v1995_v13  ;;  %v1679_v63 = vpop.f32.mrf.mxu0  ;;  %v2214_v11 = vadd.f32 %v2213_v43, %v2212_v25  ;;  %v2115_v53 = vadd.f32 %v2114_v27, %v2113_v41  ;;  %v1466_v49 = vadd.f32 %v3751_v4, %v3750_v52 }
 0x157   : > { %v2032_v15 = vadd.f32 %v3334_v7, %v1993_v31  ;;  %v1996_v8 = vadd.f32 %v2630_v22, %v1734_v47  ;;  %v2116_v39 = vsel %vm2040_vm1, %v2030_v51, 0.0  ;;  %v2215_v24 = vsel %vm2040_vm1, %v2163_v50, 0.0  ;;  %v1954_v22 = vpop.f32.mrf.mxu1 }
 0x158   : > { %2067 = vst.msk [vmem:[%s3363_s8 + $0xd0] sm:$0xff] %vm2040_vm1, %v2034_v12  ;;  %v1732_v26 = vadd.f32 %v1679_v63, %v3440_v3  ;;  %v2599_v29 = vpop.f32.mrf.mxu0  ;;  %v2117_v55 = vadd.f32 %v2116_v39, %v2115_v53  ;;  %v2216_v54 = vadd.f32 %v2215_v24, %v2214_v11  ;;  %v2219_v3 = vsel %vm2040_vm1, %v2165_v58, 0.0 }
 0x159   : > { %2065 = vst.msk [vmem:[%s3363_s8 + $0xc0] sm:$0xff] %vm2040_vm1, %v2032_v15  ;;  %v2166_v33 = vmul.f32 %v2032_v15, %v2032_v15  ;;  %v2035_v5 = vadd.f32 %v3334_v7, %v1996_v8  ;;  %v1737_v51 = vadd.f32 %v2599_v29, %v3444_v40  ;;  %v2168_v57 = vmul.f32 %v2034_v12, %v2034_v12  ;;  %v2634_v40 = vpop.f32.mrf.mxu1 }
 0x15a   : > { %v1994_v48 = vadd.f32 %v1941_v35, %v1732_v26  ;;  %v1692_v9 = vpop.f32.mrf.mxu0  ;;  %v2218_v56 = vadd.f32 %v2217_v0, %v2216_v54  ;;  %v2119_v16 = vadd.f32 %v2118_v17, %v2117_v55  ;;  %v2120_v28 = vsel %vm2040_vm1, %v2032_v15, 0.0 }
 0x15b   : > { %v1735_v19 = vadd.f32 %v1692_v9, %v3448_v10  ;;  %2068 = vst.msk [vmem:[%s3363_s8 + $0xd8] sm:$0xff] %vm2040_vm1, %v2035_v5  ;;  %v1999_v1 = vadd.f32 %v2633_v46, %v1737_v51  ;;  %v2221_v44 = vsel %vm2040_vm1, %v2166_v33, 0.0  ;;  %v2124_v62 = vsel %vm2040_vm1, %v2034_v12, 0.0  ;;  %v1957_v13 = vpop.f32.mrf.mxu1 }
 0x15c   : > { %v2033_v38 = vadd.f32 %v3334_v7, %v1994_v48  ;;  %v2600_v36 = vpop.f32.mrf.mxu0  ;;  %v2121_v42 = vadd.f32 %v2120_v28, %v2119_v16  ;;  %v2220_v34 = vadd.f32 %v2219_v3, %v2218_v56  ;;  %v2169_v37 = vmul.f32 %v2035_v5, %v2035_v5 }
 0x15d   : > { %v1997_v30 = vadd.f32 %v1954_v22, %v1735_v19  ;;  %v1738_v18 = vadd.f32 %v2600_v36, %v3458_v6  ;;  %v2038_v61 = vadd.f32 %v3334_v7, %v1999_v1  ;;  %v2225_v14 = vsel %vm2040_vm1, %v2168_v57, 0.0 }
 0x15e   : > { %2066 = vst.msk [vmem:[%s3363_s8 + $0xc8] sm:$0xff] %vm2040_vm1, %v2033_v38  ;;  %v2122_v10 = vsel %vm2040_vm1, %v2033_v38, 0.0  ;;  %v2167_v35 = vmul.f32 %v2033_v38, %v2033_v38  ;;  %v1695_v20 = vpop.f32.mrf.mxu0  ;;  %v2222_v21 = vadd.f32 %v2221_v44, %v2220_v34  ;;  %v2126_v2 = vsel %vm2040_vm1, %v2035_v5, 0.0 }
 0x15f   : > { %v2123_v32 = vadd.f32 %v2122_v10, %v2121_v42  ;;  %v2036_v60 = vadd.f32 %v3334_v7, %v1997_v30  ;;  %v2000_v59 = vadd.f32 %v2634_v40, %v1738_v18  ;;  %2071 = vst.msk [vmem:[%s3363_s8 + $0xf0] sm:$0xff] %vm2040_vm1, %v2038_v61  ;;  %v1736_v23 = vadd.f32 %v1695_v20, %v1466_v49 }
 0x160   : > { %v2223_v6 = vsel %vm2040_vm1, %v2167_v35, 0.0  ;;  %v2227_v58 = vsel %vm2040_vm1, %v2169_v37, 0.0  ;;  %v2172_v11 = vmul.f32 %v2038_v61, %v2038_v61  ;;  %v2132_v49 = vsel %vm2040_vm1, %v2038_v61, 0.0 }
 0x161   : > { %v2125_v43 = vadd.f32 %v2124_v62, %v2123_v32  ;;  %v2224_v45 = vadd.f32 %v2223_v6, %v2222_v21  ;;  %2069 = vst.msk [vmem:[%s3363_s8 + $0xe0] sm:$0xff] %vm2040_vm1, %v2036_v60  ;;  %v2170_v41 = vmul.f32 %v2036_v60, %v2036_v60  ;;  %v2039_v25 = vadd.f32 %v3334_v7, %v2000_v59 }
 0x162   : > { %v1998_v31 = vadd.f32 %v1957_v13, %v1736_v23  ;;  %v2128_v27 = vsel %vm2040_vm1, %v2036_v60, 0.0 }
 0x163   : > { %v2226_v47 = vadd.f32 %v2225_v14, %v2224_v45  ;;  %v2127_v46 = vadd.f32 %v2126_v2, %v2125_v43  ;;  %2072 = vst.msk [vmem:[%s3363_s8 + $0xf8] sm:$0xff] %vm2040_vm1, %v2039_v25  ;;  %v2229_v53 = vsel %vm2040_vm1, %v2170_v41, 0.0  ;;  %v2173_v39 = vmul.f32 %v2039_v25, %v2039_v25 }
 0x164   : > { %v2037_v50 = vadd.f32 %v3334_v7, %v1998_v31  ;;  %v2233_v7 = vsel %vm2040_vm1, %v2172_v11, 0.0  ;;  %v2134_v0 = vsel %vm2040_vm1, %v2039_v25, 0.0 }
 0x165   : > { %v2129_v12 = vadd.f32 %v2128_v27, %v2127_v46  ;;  %v2228_v63 = vadd.f32 %v2227_v58, %v2226_v47  ;;  %v2235_v54 = vsel %vm2040_vm1, %v2173_v39, 0.0 }
 0x166   : > { %2070 = vst.msk [vmem:[%s3363_s8 + $0xe8] sm:$0xff] %vm2040_vm1, %v2037_v50  ;;  %v2130_v15 = vsel %vm2040_vm1, %v2037_v50, 0.0  ;;  %v2171_v8 = vmul.f32 %v2037_v50, %v2037_v50 }
 0x167   : > { %v2230_v52 = vadd.f32 %v2229_v53, %v2228_v63  ;;  %v2131_v4 = vadd.f32 %v2130_v15, %v2129_v12 }
 0x168   : > { %v2231_v24 = vsel %vm2040_vm1, %v2171_v8, 0.0 }
 0x169   : > { %v2133_v26 = vadd.f32 %v2132_v49, %v2131_v4  ;;  %v2232_v29 = vadd.f32 %v2231_v24, %v2230_v52 }
 0x16b   : > { %v2135_v17 = vadd.f32 %v2134_v0, %v2133_v26  ;;  %v2234_v55 = vadd.f32 %v2233_v7, %v2232_v29 }
 0x16d   : > { %v2136_v22 = vrot.slane %v2135_v17, 4  ;;  %v2236_v33 = vadd.f32 %v2235_v54, %v2234_v55 }
 0x16f   : > { %v2137_v5 = vadd.f32 %v2136_v22, %v2135_v17  ;;  %v2237_v48 = vrot.slane %v2236_v33, 4 }
 0x171   : > { %v2138_v51 = vrot.slane %v2137_v5, 2  ;;  %v2238_v9 = vadd.f32 %v2237_v48, %v2236_v33 }
 0x173   : > { %v2139_v3 = vadd.f32 %v2138_v51, %v2137_v5  ;;  %v2239_v56 = vrot.slane %v2238_v9, 2 }
 0x175   : > { %v2140_v16 = vrot.slane %v2139_v3, 1  ;;  %v2240_v19 = vadd.f32 %v2239_v56, %v2238_v9 }
 0x177   : > { %v2241_v57 = vrot.slane %v2240_v19, 1  ;;  %v2141_v28 = vadd.f32 %v2140_v16, %v2139_v3 }
 0x179   : > { %v2242_v38 = vadd.f32 %v2241_v57, %v2240_v19 }
 0x17b   : > { %v2244_v1 = vsel %vm2243_vm3, %v2141_v28, %v2242_v38 }
 0x17c   : > { %2246 = vst.msk [vmem:[%s208_s12] sm:$0x3] %vm2245_vm4, %v2244_v1 }
 0x17d PF: > { %s15_s15 = sadd.s32 1, %s2670_s15  }
 0x17e   : > { %p12_p4 = scmp.ge.s32.totalorder %s15_s15, 4  }
 0x180   :  { %14 = sbr.rel (!%p12_p4) target bundleno = 1 (0x1), region = 77 }

</bundles_post_ra>
